<compile_context>
chip_gen: v7x
topology: tpu7x:2x2x1
jax: 0.10.0
libtpu: 0.0.40
codegen_flags: <defaults>
</compile_context>

<pallas_src>
import functools

import jax
import jax.numpy as jnp
from jax.experimental import pallas as pl
from jax.experimental.pallas import tpu as pltpu


# ----------------------------------------------------------------------------
# Pallas kernels
# ----------------------------------------------------------------------------
def _gemm_shift_lrelu_kernel(x_ref, w_ref, shift_ref, o_ref, *, slope):
    """(tm, K) bf16 @ (K, Co) bf16 -> f32 acc, + per-channel shift, LeakyReLU."""
    acc = jnp.dot(x_ref[...], w_ref[...], preferred_element_type=jnp.float32)
    y = acc + shift_ref[...]                 # BN scale is pre-folded into w
    o_ref[...] = jnp.where(y > 0, y, slope * y).astype(o_ref.dtype)


def gemm_shift_lrelu(x, w, shift, slope, out_dtype):
    """Fused (M, K) @ (K, Co) + shift + LeakyReLU(slope). bf16 MXU, f32 epilogue."""
    M, K = x.shape
    Co = w.shape[1]
    x = x.astype(jnp.bfloat16)
    w = w.astype(jnp.bfloat16)
    shift = shift.astype(jnp.float32)
    if M <= 512:                  # one tile covering all rows (no padding copy)
        tm, gm = M, 1
    else:                         # large M: 512-row tiles; ragged tail is harmless
        tm, gm = 512, pl.cdiv(M, 512)
    return pl.pallas_call(
        functools.partial(_gemm_shift_lrelu_kernel, slope=slope),
        out_shape=jax.ShapeDtypeStruct((M, Co), out_dtype),
        grid_spec=pltpu.PrefetchScalarGridSpec(
            num_scalar_prefetch=0,
            grid=(gm,),
            in_specs=[
                pl.BlockSpec((tm, K), lambda i: (i, 0)),
                pl.BlockSpec((K, Co), lambda i: (0, 0)),
                pl.BlockSpec((1, Co), lambda i: (0, 0)),
            ],
            out_specs=pl.BlockSpec((tm, Co), lambda i: (i, 0)),
        ),
        compiler_params=pltpu.CompilerParams(
            dimension_semantics=("parallel",)),
    )(x, w, shift)


def _maxpool2_kernel(x_ref, o_ref, *, C):
    # x_ref: (N, 2, Hp, 2, Wp, 2*C)  ->  o_ref: (N, Hp, Wp, C)
    v = x_ref[...]
    # max over the depth pair (dim 1) and the height pair (dim 3)
    m = jnp.maximum(jnp.maximum(v[:, 0, :, 0], v[:, 0, :, 1]),
                    jnp.maximum(v[:, 1, :, 0], v[:, 1, :, 1]))   # (N, Hp, Wp, 2C)
    # max over the width pair (w_low is the major half of the fused lane dim)
    o_ref[...] = jnp.maximum(m[..., :C], m[..., C:])


def maxpool3d_2(x):
    """MaxPool3d(kernel=2, stride=2), floor semantics, channel-last (NDHWC) input."""
    B, D, H, W, C = x.shape
    Dp, Hp, Wp = D // 2, H // 2, W // 2
    x = x[:, :2 * Dp, :2 * Hp, :2 * Wp, :]
    # Metadata-only reshape: pooling-window taps become explicit axes; the
    # W-window pair merges with channels so the minor dims stay lane-contiguous.
    N = B * Dp
    xr = x.reshape(N, 2, Hp, 2, Wp, 2 * C)
    out = pl.pallas_call(
        functools.partial(_maxpool2_kernel, C=C),
        out_shape=jax.ShapeDtypeStruct((N, Hp, Wp, C), x.dtype),
        grid_spec=pltpu.PrefetchScalarGridSpec(
            num_scalar_prefetch=0,
            grid=(1,),    # single block: the whole pooled tensor is well under 1 MiB
            in_specs=[pl.BlockSpec((N, 2, Hp, 2, Wp, 2 * C),
                                   lambda i: (0, 0, 0, 0, 0, 0))],
            out_specs=pl.BlockSpec((N, Hp, Wp, C), lambda i: (0, 0, 0, 0)),
        ),
    )(xr)
    return out.reshape(B, Dp, Hp, Wp, C)


# ----------------------------------------------------------------------------
# Glue: channel-last im2col + layer wrappers (reshapes / slices only)
# ----------------------------------------------------------------------------
def _im2col_ndhwc(x, ksize, stride):
    """(B, D, H, W, C) -> ((B*Do*Ho*Wo, T*C), (Do, Ho, Wo)).
    Feature order: (kd, kh, kw) outer, C inner (weights are reordered to match)."""
    B, D, H, W, C = x.shape
    kd, kh, kw = ksize
    sd, sh, sw = stride
    Do = (D - kd) // sd + 1
    Ho = (H - kh) // sh + 1
    Wo = (W - kw) // sw + 1
    cols = []
    for i in range(kd):
        for j in range(kh):
            for k in range(kw):
                cols.append(x[:, i:i + sd * Do:sd,
                              j:j + sh * Ho:sh,
                              k:k + sw * Wo:sw, :])
    patches = jnp.concatenate(cols, axis=-1)         # (B, Do, Ho, Wo, T*C)
    return patches.reshape(B * Do * Ho * Wo, kd * kh * kw * C), (Do, Ho, Wo)
# TODO(synk): an implicit-GEMM (grid axis over the kd*kh*kw taps feeding strided
# x slices straight into a VMEM accumulator) would avoid materializing the
# patches matrix; stride-2 taps are not expressible in a BlockSpec index_map, so
# the explicit channel-last (lane-contiguous) im2col is kept here.


def conv3d_bn_lrelu(x, w_mat, shift, ksize, stride, slope):
    """Conv3d (VALID, strided) + folded BatchNorm3d(eval) + LeakyReLU, NDHWC in/out."""
    B = x.shape[0]
    Co = w_mat.shape[1]
    patches, (Do, Ho, Wo) = _im2col_ndhwc(x, ksize, stride)
    out = gemm_shift_lrelu(patches, w_mat, shift, slope, jnp.bfloat16)
    return out.reshape(B, Do, Ho, Wo, Co)


# ----------------------------------------------------------------------------
# Parameter folding (PyTorch layouts -> bf16 GEMM matrices, done once)
# ----------------------------------------------------------------------------
def fold_conv_bn(w, b, gamma, beta, rmean, rvar, eps):
    """Conv3d weight (Co, Cin, kd, kh, kw) + BN3d(eval) -> bf16 (kd*kh*kw*Cin, Co)
    with the BN scale folded in, plus f32 shift of shape (1, Co)."""
    co = w.shape[0]
    scale = gamma / jnp.sqrt(rvar + eps)
    shift = (b - rmean) * scale + beta
    wm = jnp.transpose(w, (2, 3, 4, 1, 0)).reshape(-1, co)   # taps outer, C inner
    wm = (wm * scale[None, :]).astype(jnp.bfloat16)
    return wm, shift[None, :].astype(jnp.float32)


def fold_linear_bn(w, b, gamma, beta, rmean, rvar, eps, feat_shape):
    """Linear weight (Co, flat_fts) + BN1d(eval) -> bf16 (K, Co) + f32 shift (1, Co).

    PyTorch's nn.Flatten runs over an NCDHW activation, i.e. K is ordered
    (C, D, H, W).  The runtime activation is channel-last (D, H, W, C), so the
    permutation is folded into the weight here (zero runtime cost)."""
    C, Dp, Hp, Wp = feat_shape
    co = w.shape[0]
    scale = gamma / jnp.sqrt(rvar + eps)
    shift = (b - rmean) * scale + beta
    w = w.reshape(co, C, Dp, Hp, Wp)
    w = jnp.transpose(w, (0, 2, 3, 4, 1)).reshape(co, -1)    # K order -> (D,H,W,C)
    wm = (w.T * scale[None, :]).astype(jnp.bfloat16)
    return wm, shift[None, :].astype(jnp.float32)


def prepare_params(raw, pooled_feat_shape):
    """pooled_feat_shape: (C, Dp, Hp, Wp) of the activation entering Flatten."""
    c1w, c1s = fold_conv_bn(**raw["conv1"], eps=1e-4)    # BatchNorm3d(eps=0.0001)
    c2w, c2s = fold_conv_bn(**raw["conv2"], eps=1e-4)
    lw, ls = fold_linear_bn(**raw["linear"], eps=1e-5,   # BatchNorm1d default eps
                            feat_shape=pooled_feat_shape)
    return {"conv1_w": c1w, "conv1_shift": c1s,
            "conv2_w": c2w, "conv2_shift": c2s,
            "lin_w": lw, "lin_shift": ls}


# ----------------------------------------------------------------------------
# Forward pass
# ----------------------------------------------------------------------------
def voxnet_encoder_forward(x, p):
    """x: (B, C, D, H, W) float32 (PyTorch NCDHW). Returns (B, output_size) f32."""
    x = jnp.transpose(x, (0, 2, 3, 4, 1)).astype(jnp.bfloat16)   # NDHWC, bf16 once
    x = conv3d_bn_lrelu(x, p["conv1_w"], p["conv1_shift"],
                        ksize=(5, 5, 5), stride=(2, 2, 2), slope=0.1)
    x = conv3d_bn_lrelu(x, p["conv2_w"], p["conv2_shift"],
                        ksize=(3, 3, 3), stride=(1, 1, 1), slope=0.1)
    x = maxpool3d_2(x)                                           # (B, Dp, Hp, Wp, C)
    B = x.shape[0]
    # The NCDHW flatten permutation is already folded into lin_w, so a plain
    # channel-last reshape is bit-compatible with nn.Flatten + nn.Linear.
    x = x.reshape(B, -1)
    return gemm_shift_lrelu(x, p["lin_w"], p["lin_shift"],
                            slope=0.01, out_dtype=jnp.float32)


# ----------------------------------------------------------------------------
# Deterministic parameter construction
# ----------------------------------------------------------------------------
def make_layer_params(key, co, w_shape):
    k1, k2, k3, k4, k5, k6 = jax.random.split(key, 6)
    return dict(
        w=0.05 * jax.random.normal(k1, w_shape, jnp.float32),
        b=0.05 * jax.random.normal(k2, (co,), jnp.float32),
        gamma=1.0 + 0.1 * jax.random.normal(k3, (co,), jnp.float32),
        beta=0.1 * jax.random.normal(k4, (co,), jnp.float32),
        rmean=0.1 * jax.random.normal(k5, (co,), jnp.float32),
        rvar=1.0 + 0.1 * jax.random.uniform(k6, (co,), jnp.float32),
    )


if __name__ == "__main__":
    key = jax.random.PRNGKey(0)
    kx, k1, k2, k3 = jax.random.split(key, 4)

    # Small shapes consistent with VoxNetEncoder (channel_mult = 32 is fixed by
    # the module). Spatial sizes keep every stage valid:
    #   conv1 (k5,s2): 16,16,12 -> 6,6,4 ; conv2 (k3,s1): -> 4,4,2 ;
    #   maxpool(2): -> 2,2,1 ; flat_fts = 32*2*2*1 = 128.
    batch, in_channels = 2, 4
    D, H, W = 16, 16, 12
    cm = 32                      # channel_mult (hardcoded in the module)
    output_size = 256
    Dp, Hp, Wp = 2, 2, 1         # spatial shape entering Flatten
    flat_fts = cm * Dp * Hp * Wp

    raw = {
        "conv1": make_layer_params(k1, cm, (cm, in_channels, 5, 5, 5)),
        "conv2": make_layer_params(k2, cm, (cm, cm, 3, 3, 3)),
        "linear": make_layer_params(k3, output_size, (output_size, flat_fts)),
    }
    params = prepare_params(raw, pooled_feat_shape=(cm, Dp, Hp, Wp))

    x = jax.random.normal(kx, (batch, in_channels, D, H, W), jnp.float32)

    out = jax.jit(voxnet_encoder_forward)(x, params)
    out = jax.block_until_ready(out)

    assert out.shape == (batch, output_size), out.shape
    assert jnp.all(jnp.isfinite(out))
    print("KERNEL_OK")
</pallas_src>

<mosaic_0001>
module attributes {stable_mosaic.version = 11 : i64} {
  func.func @_gemm_shift_lrelu_kernel(%arg0: i32, %arg1: memref<288x500xbf16, #tpu.memory_space<vmem>>, %arg2: memref<500x32xbf16, #tpu.memory_space<vmem>>, %arg3: memref<1x32xf32, #tpu.memory_space<vmem>>, %arg4: memref<288x32xbf16, #tpu.memory_space<vmem>>) attributes {dimension_semantics = [#tpu.dimension_semantics<parallel>], iteration_bounds = array<i64: 1>, scalar_prefetch = 0 : i64, scratch_operands = 0 : i64, tpu.core_type = #tpu.core_type<tc>, window_params = [{transform_indices = @transform_0, window_bounds = array<i64: 288, 500>}, {pipeline_mode = #tpu.pipeline_mode<synchronous>, transform_indices = @transform_1, window_bounds = array<i64: 500, 32>}, {pipeline_mode = #tpu.pipeline_mode<synchronous>, transform_indices = @transform_2, window_bounds = array<i64: 1, 32>}, {transform_indices = @transform_3, window_bounds = array<i64: 288, 32>}]} {
    %c0 = arith.constant 0 : index
    %c0_0 = arith.constant 0 : index
    %0 = vector.load %arg1[%c0, %c0_0] : memref<288x500xbf16, #tpu.memory_space<vmem>>, vector<288x500xbf16>
    %c0_1 = arith.constant 0 : index
    %c0_2 = arith.constant 0 : index
    %1 = vector.load %arg2[%c0_1, %c0_2] : memref<500x32xbf16, #tpu.memory_space<vmem>>, vector<500x32xbf16>
    %cst = arith.constant dense<0.000000e+00> : vector<288x32xf32>
    %2 = tpu.matmul %0, %1, %cst {dimension_numbers = #tpu.dot_dimension_numbers<[1], [0], [0], [1], [0, 0, 1, 1], [], []>} : vector<288x500xbf16>, vector<500x32xbf16>, vector<288x32xf32> -> vector<288x32xf32>
    %c0_3 = arith.constant 0 : index
    %c0_4 = arith.constant 0 : index
    %3 = vector.load %arg3[%c0_3, %c0_4] : memref<1x32xf32, #tpu.memory_space<vmem>>, vector<1x32xf32>
    %4 = vector.broadcast %3 : vector<1x32xf32> to vector<288x32xf32>
    %5 = arith.addf %2, %4 : vector<288x32xf32>
    %cst_5 = arith.constant 0.000000e+00 : f32
    %6 = vector.broadcast %cst_5 : f32 to vector<288x32xf32>
    %7 = arith.cmpf ogt, %5, %6 : vector<288x32xf32>
    %cst_6 = arith.constant 1.000000e-01 : f32
    %8 = vector.broadcast %cst_6 : f32 to vector<288x32xf32>
    %9 = arith.mulf %8, %5 : vector<288x32xf32>
    %10 = arith.select %7, %5, %9 : vector<288x32xi1>, vector<288x32xf32>
    %11 = arith.truncf %10 : vector<288x32xf32> to vector<288x32xbf16>
    %c0_7 = arith.constant 0 : index
    %c0_8 = arith.constant 0 : index
    %12 = vector.load %arg4[%c0_7, %c0_8] : memref<288x32xbf16, #tpu.memory_space<vmem>>, vector<288x32xbf16>
    tpu.vector_store %arg4[%c0_7, %c0_8], %11 {strides = array<i32>} : memref<288x32xbf16, #tpu.memory_space<vmem>>, vector<288x32xbf16>,
    return
  }
  func.func @transform_0(%arg0: i32) -> (i32, i32) {
    %c0_i32 = arith.constant 0 : i32
    %c0_i32_0 = arith.constant 0 : i32
    return %arg0, %c0_i32 : i32, i32
  }
  func.func @transform_1(%arg0: i32) -> (i32, i32) {
    %c0_i32 = arith.constant 0 : i32
    %c0_i32_0 = arith.constant 0 : i32
    %c0_i32_1 = arith.constant 0 : i32
    return %c0_i32, %c0_i32_0 : i32, i32
  }
  func.func @transform_2(%arg0: i32) -> (i32, i32) {
    %c0_i32 = arith.constant 0 : i32
    %c0_i32_0 = arith.constant 0 : i32
    %c0_i32_1 = arith.constant 0 : i32
    return %c0_i32, %c0_i32_0 : i32, i32
  }
  func.func @transform_3(%arg0: i32) -> (i32, i32) {
    %c0_i32 = arith.constant 0 : i32
    %c0_i32_0 = arith.constant 0 : i32
    return %arg0, %c0_i32 : i32, i32
  }
}

module attributes {stable_mosaic.version = 11 : i64} {
  func.func @_gemm_shift_lrelu_kernel(%arg0: i32, %arg1: memref<64x864xbf16, #tpu.memory_space<vmem>>, %arg2: memref<864x32xbf16, #tpu.memory_space<vmem>>, %arg3: memref<1x32xf32, #tpu.memory_space<vmem>>, %arg4: memref<64x32xbf16, #tpu.memory_space<vmem>>) attributes {dimension_semantics = [#tpu.dimension_semantics<parallel>], iteration_bounds = array<i64: 1>, scalar_prefetch = 0 : i64, scratch_operands = 0 : i64, tpu.core_type = #tpu.core_type<tc>, window_params = [{transform_indices = @transform_0, window_bounds = array<i64: 64, 864>}, {pipeline_mode = #tpu.pipeline_mode<synchronous>, transform_indices = @transform_1, window_bounds = array<i64: 864, 32>}, {pipeline_mode = #tpu.pipeline_mode<synchronous>, transform_indices = @transform_2, window_bounds = array<i64: 1, 32>}, {transform_indices = @transform_3, window_bounds = array<i64: 64, 32>}]} {
    %c0 = arith.constant 0 : index
    %c0_0 = arith.constant 0 : index
    %0 = vector.load %arg1[%c0, %c0_0] : memref<64x864xbf16, #tpu.memory_space<vmem>>, vector<64x864xbf16>
    %c0_1 = arith.constant 0 : index
    %c0_2 = arith.constant 0 : index
    %1 = vector.load %arg2[%c0_1, %c0_2] : memref<864x32xbf16, #tpu.memory_space<vmem>>, vector<864x32xbf16>
    %cst = arith.constant dense<0.000000e+00> : vector<64x32xf32>
    %2 = tpu.matmul %0, %1, %cst {dimension_numbers = #tpu.dot_dimension_numbers<[1], [0], [0], [1], [0, 0, 1, 1], [], []>} : vector<64x864xbf16>, vector<864x32xbf16>, vector<64x32xf32> -> vector<64x32xf32>
    %c0_3 = arith.constant 0 : index
    %c0_4 = arith.constant 0 : index
    %3 = vector.load %arg3[%c0_3, %c0_4] : memref<1x32xf32, #tpu.memory_space<vmem>>, vector<1x32xf32>
    %4 = vector.broadcast %3 : vector<1x32xf32> to vector<64x32xf32>
    %5 = arith.addf %2, %4 : vector<64x32xf32>
    %cst_5 = arith.constant 0.000000e+00 : f32
    %6 = vector.broadcast %cst_5 : f32 to vector<64x32xf32>
    %7 = arith.cmpf ogt, %5, %6 : vector<64x32xf32>
    %cst_6 = arith.constant 1.000000e-01 : f32
    %8 = vector.broadcast %cst_6 : f32 to vector<64x32xf32>
    %9 = arith.mulf %8, %5 : vector<64x32xf32>
    %10 = arith.select %7, %5, %9 : vector<64x32xi1>, vector<64x32xf32>
    %11 = arith.truncf %10 : vector<64x32xf32> to vector<64x32xbf16>
    %c0_7 = arith.constant 0 : index
    %c0_8 = arith.constant 0 : index
    %12 = vector.load %arg4[%c0_7, %c0_8] : memref<64x32xbf16, #tpu.memory_space<vmem>>, vector<64x32xbf16>
    tpu.vector_store %arg4[%c0_7, %c0_8], %11 {strides = array<i32>} : memref<64x32xbf16, #tpu.memory_space<vmem>>, vector<64x32xbf16>,
    return
  }
  func.func @transform_0(%arg0: i32) -> (i32, i32) {
    %c0_i32 = arith.constant 0 : i32
    %c0_i32_0 = arith.constant 0 : i32
    return %arg0, %c0_i32 : i32, i32
  }
  func.func @transform_1(%arg0: i32) -> (i32, i32) {
    %c0_i32 = arith.constant 0 : i32
    %c0_i32_0 = arith.constant 0 : i32
    %c0_i32_1 = arith.constant 0 : i32
    return %c0_i32, %c0_i32_0 : i32, i32
  }
  func.func @transform_2(%arg0: i32) -> (i32, i32) {
    %c0_i32 = arith.constant 0 : i32
    %c0_i32_0 = arith.constant 0 : i32
    %c0_i32_1 = arith.constant 0 : i32
    return %c0_i32, %c0_i32_0 : i32, i32
  }
  func.func @transform_3(%arg0: i32) -> (i32, i32) {
    %c0_i32 = arith.constant 0 : i32
    %c0_i32_0 = arith.constant 0 : i32
    return %arg0, %c0_i32 : i32, i32
  }
}

module attributes {stable_mosaic.version = 11 : i64} {
  func.func @_maxpool2_kernel(%arg0: i32, %arg1: memref<4x2x2x2x1x64xbf16, #tpu.memory_space<vmem>>, %arg2: memref<4x2x1x32xbf16, #tpu.memory_space<vmem>>) attributes {dimension_semantics = [#tpu.dimension_semantics<arbitrary>], iteration_bounds = array<i64: 1>, scalar_prefetch = 0 : i64, scratch_operands = 0 : i64, tpu.core_type = #tpu.core_type<tc>, window_params = [{pipeline_mode = #tpu.pipeline_mode<synchronous>, transform_indices = @transform_0, window_bounds = array<i64: 4, 2, 2, 2, 1, 64>}, {pipeline_mode = #tpu.pipeline_mode<synchronous>, transform_indices = @transform_1, window_bounds = array<i64: 4, 2, 1, 32>}]} {
    %c0 = arith.constant 0 : index
    %c0_0 = arith.constant 0 : index
    %c0_1 = arith.constant 0 : index
    %c0_2 = arith.constant 0 : index
    %c0_3 = arith.constant 0 : index
    %c0_4 = arith.constant 0 : index
    %0 = vector.load %arg1[%c0, %c0_0, %c0_1, %c0_2, %c0_3, %c0_4] : memref<4x2x2x2x1x64xbf16, #tpu.memory_space<vmem>>, vector<4x2x2x2x1x64xbf16>
    %1 = vector.extract_strided_slice %0 {offsets = [0, 0, 0, 0, 0, 0], sizes = [4, 1, 2, 1, 1, 64], strides = [1, 1, 1, 1, 1, 1]} : vector<4x2x2x2x1x64xbf16> to vector<4x1x2x1x1x64xbf16>
    %2 = vector.shape_cast %1 : vector<4x1x2x1x1x64xbf16> to vector<4x2x1x64xbf16>
    %3 = vector.extract_strided_slice %0 {offsets = [0, 0, 0, 1, 0, 0], sizes = [4, 1, 2, 1, 1, 64], strides = [1, 1, 1, 1, 1, 1]} : vector<4x2x2x2x1x64xbf16> to vector<4x1x2x1x1x64xbf16>
    %4 = vector.shape_cast %3 : vector<4x1x2x1x1x64xbf16> to vector<4x2x1x64xbf16>
    %5 = arith.maximumf %2, %4 : vector<4x2x1x64xbf16>
    %6 = vector.extract_strided_slice %0 {offsets = [0, 1, 0, 0, 0, 0], sizes = [4, 1, 2, 1, 1, 64], strides = [1, 1, 1, 1, 1, 1]} : vector<4x2x2x2x1x64xbf16> to vector<4x1x2x1x1x64xbf16>
    %7 = vector.shape_cast %6 : vector<4x1x2x1x1x64xbf16> to vector<4x2x1x64xbf16>
    %8 = vector.extract_strided_slice %0 {offsets = [0, 1, 0, 1, 0, 0], sizes = [4, 1, 2, 1, 1, 64], strides = [1, 1, 1, 1, 1, 1]} : vector<4x2x2x2x1x64xbf16> to vector<4x1x2x1x1x64xbf16>
    %9 = vector.shape_cast %8 : vector<4x1x2x1x1x64xbf16> to vector<4x2x1x64xbf16>
    %10 = arith.maximumf %7, %9 : vector<4x2x1x64xbf16>
    %11 = arith.maximumf %5, %10 : vector<4x2x1x64xbf16>
    %12 = vector.extract_strided_slice %11 {offsets = [0, 0, 0, 0], sizes = [4, 2, 1, 32], strides = [1, 1, 1, 1]} : vector<4x2x1x64xbf16> to vector<4x2x1x32xbf16>
    %13 = vector.extract_strided_slice %11 {offsets = [0, 0, 0, 32], sizes = [4, 2, 1, 32], strides = [1, 1, 1, 1]} : vector<4x2x1x64xbf16> to vector<4x2x1x32xbf16>
    %14 = arith.maximumf %12, %13 : vector<4x2x1x32xbf16>
    %c0_5 = arith.constant 0 : index
    %c0_6 = arith.constant 0 : index
    %c0_7 = arith.constant 0 : index
    %c0_8 = arith.constant 0 : index
    %15 = vector.load %arg2[%c0_5, %c0_6, %c0_7, %c0_8] : memref<4x2x1x32xbf16, #tpu.memory_space<vmem>>, vector<4x2x1x32xbf16>
    tpu.vector_store %arg2[%c0_5, %c0_6, %c0_7, %c0_8], %14 {strides = array<i32>} : memref<4x2x1x32xbf16, #tpu.memory_space<vmem>>, vector<4x2x1x32xbf16>,
    return
  }
  func.func @transform_0(%arg0: i32) -> (i32, i32, i32, i32, i32, i32) {
    %c0_i32 = arith.constant 0 : i32
    %c0_i32_0 = arith.constant 0 : i32
    %c0_i32_1 = arith.constant 0 : i32
    %c0_i32_2 = arith.constant 0 : i32
    %c0_i32_3 = arith.constant 0 : i32
    %c0_i32_4 = arith.constant 0 : i32
    %c0_i32_5 = arith.constant 0 : i32
    return %c0_i32, %c0_i32_0, %c0_i32_1, %c0_i32_2, %c0_i32_3, %c0_i32_4 : i32, i32, i32, i32, i32, i32
  }
  func.func @transform_1(%arg0: i32) -> (i32, i32, i32, i32) {
    %c0_i32 = arith.constant 0 : i32
    %c0_i32_0 = arith.constant 0 : i32
    %c0_i32_1 = arith.constant 0 : i32
    %c0_i32_2 = arith.constant 0 : i32
    %c0_i32_3 = arith.constant 0 : i32
    return %c0_i32, %c0_i32_0, %c0_i32_1, %c0_i32_2 : i32, i32, i32, i32
  }
}

module attributes {stable_mosaic.version = 11 : i64} {
  func.func @_gemm_shift_lrelu_kernel(%arg0: i32, %arg1: memref<2x128xbf16, #tpu.memory_space<vmem>>, %arg2: memref<128x256xbf16, #tpu.memory_space<vmem>>, %arg3: memref<1x256xf32, #tpu.memory_space<vmem>>, %arg4: memref<2x256xf32, #tpu.memory_space<vmem>>) attributes {dimension_semantics = [#tpu.dimension_semantics<parallel>], iteration_bounds = array<i64: 1>, scalar_prefetch = 0 : i64, scratch_operands = 0 : i64, tpu.core_type = #tpu.core_type<tc>, window_params = [{transform_indices = @transform_0, window_bounds = array<i64: 2, 128>}, {pipeline_mode = #tpu.pipeline_mode<synchronous>, transform_indices = @transform_1, window_bounds = array<i64: 128, 256>}, {pipeline_mode = #tpu.pipeline_mode<synchronous>, transform_indices = @transform_2, window_bounds = array<i64: 1, 256>}, {transform_indices = @transform_3, window_bounds = array<i64: 2, 256>}]} {
    %c0 = arith.constant 0 : index
    %c0_0 = arith.constant 0 : index
    %0 = vector.load %arg1[%c0, %c0_0] : memref<2x128xbf16, #tpu.memory_space<vmem>>, vector<2x128xbf16>
    %c0_1 = arith.constant 0 : index
    %c0_2 = arith.constant 0 : index
    %1 = vector.load %arg2[%c0_1, %c0_2] : memref<128x256xbf16, #tpu.memory_space<vmem>>, vector<128x256xbf16>
    %cst = arith.constant dense<0.000000e+00> : vector<2x256xf32>
    %2 = tpu.matmul %0, %1, %cst {dimension_numbers = #tpu.dot_dimension_numbers<[1], [0], [0], [1], [0, 0, 1, 1], [], []>} : vector<2x128xbf16>, vector<128x256xbf16>, vector<2x256xf32> -> vector<2x256xf32>
    %c0_3 = arith.constant 0 : index
    %c0_4 = arith.constant 0 : index
    %3 = vector.load %arg3[%c0_3, %c0_4] : memref<1x256xf32, #tpu.memory_space<vmem>>, vector<1x256xf32>
    %4 = vector.broadcast %3 : vector<1x256xf32> to vector<2x256xf32>
    %5 = arith.addf %2, %4 : vector<2x256xf32>
    %cst_5 = arith.constant 0.000000e+00 : f32
    %6 = vector.broadcast %cst_5 : f32 to vector<2x256xf32>
    %7 = arith.cmpf ogt, %5, %6 : vector<2x256xf32>
    %cst_6 = arith.constant 0.00999999977 : f32
    %8 = vector.broadcast %cst_6 : f32 to vector<2x256xf32>
    %9 = arith.mulf %8, %5 : vector<2x256xf32>
    %10 = arith.select %7, %5, %9 : vector<2x256xi1>, vector<2x256xf32>
    %c0_7 = arith.constant 0 : index
    %c0_8 = arith.constant 0 : index
    %11 = vector.load %arg4[%c0_7, %c0_8] : memref<2x256xf32, #tpu.memory_space<vmem>>, vector<2x256xf32>
    tpu.vector_store %arg4[%c0_7, %c0_8], %10 {strides = array<i32>} : memref<2x256xf32, #tpu.memory_space<vmem>>, vector<2x256xf32>,
    return
  }
  func.func @transform_0(%arg0: i32) -> (i32, i32) {
    %c0_i32 = arith.constant 0 : i32
    %c0_i32_0 = arith.constant 0 : i32
    return %arg0, %c0_i32 : i32, i32
  }
  func.func @transform_1(%arg0: i32) -> (i32, i32) {
    %c0_i32 = arith.constant 0 : i32
    %c0_i32_0 = arith.constant 0 : i32
    %c0_i32_1 = arith.constant 0 : i32
    return %c0_i32, %c0_i32_0 : i32, i32
  }
  func.func @transform_2(%arg0: i32) -> (i32, i32) {
    %c0_i32 = arith.constant 0 : i32
    %c0_i32_0 = arith.constant 0 : i32
    %c0_i32_1 = arith.constant 0 : i32
    return %c0_i32, %c0_i32_0 : i32, i32
  }
  func.func @transform_3(%arg0: i32) -> (i32, i32) {
    %c0_i32 = arith.constant 0 : i32
    %c0_i32_0 = arith.constant 0 : i32
    return %arg0, %c0_i32 : i32, i32
  }
}

</mosaic_0001>

<bundles_post_ra>
// kernel: voxnet_encoder_forward.4
= control target key start
LH: loop header
LB: loop body
LE: loop exit
PB: predicated region body
PF: predicated region fallthrough
CT: control target
= control target key end

     0   :  { %v1802_v0 = vmov 0   ;;  %vm688_vm0 = vcmask 949248   ;;  %vm743_vm1 = vcmask 1041408   ;;  %vm1353_vm3 = vcmask 257024   ;;  %s2370_s1 = inlined_call_operand.vmem [shape: bf16[500,32], index: 1, kind: input, shape index: {}]   ;;  %s2371_s0 = inlined_call_operand.vmem [shape: bf16[288,500], index: 0, kind: input, shape index: {}]   ;;  %s2372_s2 = inlined_call_operand.vmem [shape: f32[1,32], index: 2, kind: input, shape index: {}]   ;;  %s2373_s3 = inlined_call_operand.vmem [shape: bf16[288,32], index: 3, kind: output, shape index: {}]  }
   0x1   :  { %747 = vmatprep.subr.bf16.mxu1 %v1802_v0  ;;  %924 = vmatprep.subr.bf16.mxu0 %v1802_v0  ;;  %v1662_v1 = vld [vmem:[%s2370_s1] sm:$0xff]   ;;  %v1664_v3 = vld [vmem:[%s2370_s1 + $0x8] sm:$0xff]   ;;  %v1666_v5 = vld [vmem:[%s2370_s1 + $0x10] sm:$0xff]  }
   0x2   :  { %v1663_v2 = vld [vmem:[%s2370_s1 + $0x80] sm:$0xff]   ;;  %748 = vmatpush1.bf16.msra.mxu1 %v1662_v1  ;;  %v1665_v4 = vld [vmem:[%s2370_s1 + $0x88] sm:$0xff]   ;;  %v1667_v6 = vld [vmem:[%s2370_s1 + $0x90] sm:$0xff]  }
   0x3   :  { %925 = vmatpush1.bf16.msra.mxu0 %v1663_v2  ;;  %749 = vmatprep.subr.bf16.mxu1 %v1802_v0  ;;  %v1668_v7 = vld [vmem:[%s2370_s1 + $0x18] sm:$0xff]   ;;  %v1670_v9 = vld [vmem:[%s2370_s1 + $0x20] sm:$0xff]   ;;  %v1672_v11 = vld [vmem:[%s2370_s1 + $0x28] sm:$0xff]  }
   0x4   :  { %926 = vmatprep.subr.bf16.mxu0 %v1802_v0  ;;  %v1669_v8 = vld [vmem:[%s2370_s1 + $0x98] sm:$0xff]   ;;  %v1671_v10 = vld [vmem:[%s2370_s1 + $0xa0] sm:$0xff]   ;;  %v1673_v12 = vld [vmem:[%s2370_s1 + $0xa8] sm:$0xff]  }
   0x5   :  { %v1674_v13 = vld [vmem:[%s2370_s1 + $0x30] sm:$0xff]   ;;  %v1676_v15 = vld [vmem:[%s2370_s1 + $0x38] sm:$0xff]   ;;  %v1678_v17 = vld [vmem:[%s2370_s1 + $0x40] sm:$0xff]  }
   0x6   :  { %750 = vmatpush1.bf16.msra.mxu1 %v1664_v3  ;;  %v1675_v14 = vld [vmem:[%s2370_s1 + $0xb0] sm:$0xff]   ;;  %v1677_v16 = vld [vmem:[%s2370_s1 + $0xb8] sm:$0xff]   ;;  %v1679_v18 = vld [vmem:[%s2370_s1 + $0xc0] sm:$0xff]  }
   0x7   :  { %927 = vmatpush1.bf16.msra.mxu0 %v1665_v4  ;;  %751 = vmatprep.subr.bf16.mxu1 %v1802_v0  ;;  %v1696_v19 = vld [vmem:[%s2371_s0 + $0x4] ss:$16 sps:$4 sm:$0xff]   ;;  %v1680_v20 = vld [vmem:[%s2370_s1 + $0x48] sm:$0xff]   ;;  %v1684_v25 = vld [vmem:[%s2370_s1 + $0x58] sm:$0xff]  }
   0x8   :  { %928 = vmatprep.subr.bf16.mxu0 %v1802_v0  ;;  %779 = vmatprep.mubr.bf16.mxu1 %v1696_v19  ;;  %v1699_v21 = vld [vmem:[%s2371_s0 + $0xc] ss:$16 sps:$4 sm:$0xff]   ;;  %v1682_v23 = vld [vmem:[%s2370_s1 + $0x50] sm:$0xff]   ;;  %v1686_v27 = vld [vmem:[%s2370_s1 + $0x60] sm:$0xff]  }
   0x9   :  { %v1681_v22 = vld [vmem:[%s2370_s1 + $0xc8] sm:$0xff]   ;;  %1499 = vmatprep.mubr.msk.bf16.mxu0 %vm688_vm0, %v1699_v21  ;;  %v1683_v24 = vld [vmem:[%s2370_s1 + $0xd0] sm:$0xff]   ;;  %v1685_v26 = vld [vmem:[%s2370_s1 + $0xd8] sm:$0xff]  }
   0xa   :  { %752 = vmatpush1.bf16.msra.mxu1 %v1666_v5  ;;  %v1687_v28 = vld [vmem:[%s2370_s1 + $0xe0] sm:$0xff]   ;;  %v1688_v29 = vld [vmem:[%s2370_s1 + $0x68] sm:$0xff]   ;;  %v1690_v31 = vld [vmem:[%s2370_s1 + $0x70] sm:$0xff]  }
   0xb   :  { %929 = vmatpush1.bf16.msra.mxu0 %v1667_v6  ;;  %753 = vmatprep.subr.bf16.mxu1 %v1802_v0  ;;  %v1689_v30 = vld [vmem:[%s2370_s1 + $0xe8] sm:$0xff]   ;;  %v1691_v32 = vld [vmem:[%s2370_s1 + $0xf0] sm:$0xff]   ;;  %v1693_v33 = vld [vmem:[%s2370_s1 + $0xf8] ss:$0 sps:$4 sm:$0x33]  }
   0xc   :  { %930 = vmatprep.subr.bf16.mxu0 %v1802_v0  ;;  %v1692_v34 = vld [vmem:[%s2370_s1 + $0x78] sm:$0xff]   ;;  %v745_v35 = vsel %vm743_vm1, %v1693_v33, 0  ;;  %v1694_v36 = vld [vmem:[%s2371_s0] ss:$16 sps:$4 sm:$0xff]   ;;  %v1700_v38 = vld [vmem:[%s2371_s0 + $0x24] ss:$16 sps:$4 sm:$0xff]  }
   0xd   :  { %v1697_v37 = vld [vmem:[%s2371_s0 + $0x8] ss:$16 sps:$4 sm:$0xff]   ;;  %v1702_v39 = vld [vmem:[%s2371_s0 + $0x2c] ss:$16 sps:$4 sm:$0xff]   ;;  %v1704_v40 = vld [vmem:[%s2371_s0 + $0x20] ss:$16 sps:$4 sm:$0xff]  }
   0xe   :  { %754 = vmatpush1.bf16.msra.mxu1 %v1668_v7  ;;  %v1705_v41 = vld [vmem:[%s2371_s0 + $0x28] ss:$16 sps:$4 sm:$0xff]   ;;  %v1706_v42 = vld [vmem:[%s2371_s0 + $0x44] ss:$16 sps:$4 sm:$0xff]   ;;  %v1708_v43 = vld [vmem:[%s2371_s0 + $0x4c] ss:$16 sps:$4 sm:$0xff]  }
   0xf   :  { %931 = vmatpush1.bf16.msra.mxu0 %v1669_v8  ;;  %755 = vmatprep.subr.bf16.mxu1 %v1802_v0  ;;  %v1710_v44 = vld [vmem:[%s2371_s0 + $0x40] ss:$16 sps:$4 sm:$0xff]   ;;  %v1711_v45 = vld [vmem:[%s2371_s0 + $0x48] ss:$16 sps:$4 sm:$0xff]   ;;  %v1712_v46 = vld [vmem:[%s2371_s0 + $0x64] ss:$16 sps:$4 sm:$0xff]  }
  0x10   :  { %932 = vmatprep.subr.bf16.mxu0 %v1802_v0  ;;  %v1714_v47 = vld [vmem:[%s2371_s0 + $0x6c] ss:$16 sps:$4 sm:$0xff]   ;;  %v1716_v48 = vld [vmem:[%s2371_s0 + $0x60] ss:$16 sps:$4 sm:$0xff]   ;;  %v1717_v49 = vld [vmem:[%s2371_s0 + $0x68] ss:$16 sps:$4 sm:$0xff]  }
  0x11   :  { %v1718_v50 = vld [vmem:[%s2371_s0 + $0x84] ss:$16 sps:$4 sm:$0xff]   ;;  %v1720_v51 = vld [vmem:[%s2371_s0 + $0x8c] ss:$16 sps:$4 sm:$0xff]   ;;  %v1722_v52 = vld [vmem:[%s2371_s0 + $0x80] ss:$16 sps:$4 sm:$0xff]  }
  0x12   :  { %756 = vmatpush1.bf16.msra.mxu1 %v1670_v9  ;;  %v1723_v53 = vld [vmem:[%s2371_s0 + $0x88] ss:$16 sps:$4 sm:$0xff]   ;;  %v1724_v54 = vld [vmem:[%s2371_s0 + $0xa4] ss:$16 sps:$4 sm:$0xff]   ;;  %v1726_v55 = vld [vmem:[%s2371_s0 + $0xac] ss:$16 sps:$4 sm:$0xff]  }
  0x13   :  { %933 = vmatpush1.bf16.msra.mxu0 %v1671_v10  ;;  %757 = vmatprep.subr.bf16.mxu1 %v1802_v0  ;;  %v1728_v56 = vld [vmem:[%s2371_s0 + $0xa0] ss:$16 sps:$4 sm:$0xff]   ;;  %v1729_v57 = vld [vmem:[%s2371_s0 + $0xa8] ss:$16 sps:$4 sm:$0xff]   ;;  %v1730_v58 = vld [vmem:[%s2371_s0 + $0xc4] ss:$16 sps:$4 sm:$0xff]  }
  0x14   :  { %934 = vmatprep.subr.bf16.mxu0 %v1802_v0  ;;  %v1732_v59 = vld [vmem:[%s2371_s0 + $0xcc] ss:$16 sps:$4 sm:$0xff]   ;;  %v1734_v60 = vld [vmem:[%s2371_s0 + $0xc0] ss:$16 sps:$4 sm:$0xff]   ;;  %v1735_v61 = vld [vmem:[%s2371_s0 + $0xc8] ss:$16 sps:$4 sm:$0xff]  }
  0x15   :  { %v1736_v62 = vld [vmem:[%s2371_s0 + $0xe4] ss:$16 sps:$4 sm:$0xff]   ;;  %v1738_v63 = vld [vmem:[%s2371_s0 + $0xec] ss:$16 sps:$4 sm:$0xff]   ;;  %v1741_v1 = vld [vmem:[%s2371_s0 + $0xe8] ss:$16 sps:$4 sm:$0xff]  }
  0x16   :  { %758 = vmatpush1.bf16.msra.mxu1 %v1672_v11  ;;  %v1742_v2 = vld [vmem:[%s2371_s0 + $0x104] ss:$16 sps:$4 sm:$0xff]   ;;  %v1744_v3 = vld [vmem:[%s2371_s0 + $0x10c] ss:$16 sps:$4 sm:$0xff]   ;;  %v1746_v4 = vld [vmem:[%s2371_s0 + $0x100] ss:$16 sps:$4 sm:$0xff]  }
  0x17   :  { %935 = vmatpush1.bf16.msra.mxu0 %v1673_v12  ;;  %759 = vmatprep.subr.bf16.mxu1 %v1802_v0  ;;  %v1747_v5 = vld [vmem:[%s2371_s0 + $0x108] ss:$16 sps:$4 sm:$0xff]   ;;  %v1748_v6 = vld [vmem:[%s2371_s0 + $0x124] ss:$16 sps:$4 sm:$0xff]   ;;  %v1750_v7 = vld [vmem:[%s2371_s0 + $0x12c] ss:$16 sps:$4 sm:$0xff]  }
  0x18   :  { %936 = vmatprep.subr.bf16.mxu0 %v1802_v0  ;;  %v1752_v8 = vld [vmem:[%s2371_s0 + $0x120] ss:$16 sps:$4 sm:$0xff]   ;;  %v1753_v9 = vld [vmem:[%s2371_s0 + $0x128] ss:$16 sps:$4 sm:$0xff]   ;;  %v1754_v10 = vld [vmem:[%s2371_s0 + $0x144] ss:$16 sps:$4 sm:$0xff]  }
  0x19   :  { %v1756_v11 = vld [vmem:[%s2371_s0 + $0x14c] ss:$16 sps:$4 sm:$0xff]   ;;  %v1758_v12 = vld [vmem:[%s2371_s0 + $0x140] ss:$16 sps:$4 sm:$0xff]   ;;  %v1771_v21 = vld [vmem:[%s2371_s0 + $0x188] ss:$16 sps:$4 sm:$0xff]  }
  0x1a   :  { %760 = vmatpush1.bf16.msra.mxu1 %v1674_v13  ;;  %v1759_v13 = vld [vmem:[%s2371_s0 + $0x148] ss:$16 sps:$4 sm:$0xff]   ;;  %v1768_v19 = vld [vmem:[%s2371_s0 + $0x18c] ss:$16 sps:$4 sm:$0xff]  }
  0x1b   :  { %937 = vmatpush1.bf16.msra.mxu0 %v1675_v14  ;;  %761 = vmatprep.subr.bf16.mxu1 %v1802_v0  ;;  %v1760_v14 = vld [vmem:[%s2371_s0 + $0x164] ss:$16 sps:$4 sm:$0xff]   ;;  %v1789_v33 = vld [vmem:[%s2371_s0 + $0x1e8] ss:$16 sps:$4 sm:$0xff]  }
  0x1c   :  { %938 = vmatprep.subr.bf16.mxu0 %v1802_v0 }
  0x1e   :  { %762 = vmatpush1.bf16.msra.mxu1 %v1676_v15  ;;  %v1762_v15 = vld [vmem:[%s2371_s0 + $0x16c] ss:$16 sps:$4 sm:$0xff]  }
  0x1f   :  { %939 = vmatpush1.bf16.msra.mxu0 %v1677_v16  ;;  %763 = vmatprep.subr.bf16.mxu1 %v1802_v0  ;;  %v1764_v16 = vld [vmem:[%s2371_s0 + $0x160] ss:$16 sps:$4 sm:$0xff]  }
  0x20   :  { %940 = vmatprep.subr.bf16.mxu0 %v1802_v0 }
  0x22   :  { %764 = vmatpush1.bf16.msra.mxu1 %v1678_v17  ;;  %v1765_v17 = vld [vmem:[%s2371_s0 + $0x168] ss:$16 sps:$4 sm:$0xff]  }
  0x23   :  { %941 = vmatpush1.bf16.msra.mxu0 %v1679_v18  ;;  %765 = vmatprep.subr.bf16.mxu1 %v1802_v0  ;;  %v1766_v18 = vld [vmem:[%s2371_s0 + $0x184] ss:$16 sps:$4 sm:$0xff]  }
  0x24   :  { %942 = vmatprep.subr.bf16.mxu0 %v1802_v0 }
  0x26   :  { %766 = vmatpush1.bf16.msra.mxu1 %v1680_v20  ;;  %v1770_v20 = vld [vmem:[%s2371_s0 + $0x180] ss:$16 sps:$4 sm:$0xff]  }
  0x27   :  { %943 = vmatpush1.bf16.msra.mxu0 %v1681_v22  ;;  %767 = vmatprep.subr.bf16.mxu1 %v1802_v0  ;;  %v1772_v22 = vld [vmem:[%s2371_s0 + $0x1a4] ss:$16 sps:$4 sm:$0xff]  }
  0x28   :  { %944 = vmatprep.subr.bf16.mxu0 %v1802_v0 }
  0x2a   :  { %768 = vmatpush1.bf16.msra.mxu1 %v1682_v23  ;;  %v1774_v23 = vld [vmem:[%s2371_s0 + $0x1ac] ss:$16 sps:$4 sm:$0xff]  }
  0x2b   :  { %945 = vmatpush1.bf16.msra.mxu0 %v1683_v24  ;;  %769 = vmatprep.subr.bf16.mxu1 %v1802_v0  ;;  %v1776_v24 = vld [vmem:[%s2371_s0 + $0x1a0] ss:$16 sps:$4 sm:$0xff]  }
  0x2c   :  { %946 = vmatprep.subr.bf16.mxu0 %v1802_v0 }
  0x2e   :  { %770 = vmatpush1.bf16.msra.mxu1 %v1684_v25  ;;  %v1777_v25 = vld [vmem:[%s2371_s0 + $0x1a8] ss:$16 sps:$4 sm:$0xff]  }
  0x2f   :  { %947 = vmatpush1.bf16.msra.mxu0 %v1685_v26  ;;  %771 = vmatprep.subr.bf16.mxu1 %v1802_v0  ;;  %v1778_v26 = vld [vmem:[%s2371_s0 + $0x1c4] ss:$16 sps:$4 sm:$0xff]  }
  0x30   :  { %948 = vmatprep.subr.bf16.mxu0 %v1802_v0 }
  0x32   :  { %772 = vmatpush1.bf16.msra.mxu1 %v1686_v27  ;;  %v1780_v27 = vld [vmem:[%s2371_s0 + $0x1cc] ss:$16 sps:$4 sm:$0xff]  }
  0x33   :  { %949 = vmatpush1.bf16.msra.mxu0 %v1687_v28  ;;  %773 = vmatprep.subr.bf16.mxu1 %v1802_v0  ;;  %v1782_v28 = vld [vmem:[%s2371_s0 + $0x1c0] ss:$16 sps:$4 sm:$0xff]  }
  0x34   :  { %950 = vmatprep.subr.bf16.mxu0 %v1802_v0 }
  0x36   :  { %774 = vmatpush1.bf16.msra.mxu1 %v1688_v29  ;;  %v1783_v29 = vld [vmem:[%s2371_s0 + $0x1c8] ss:$16 sps:$4 sm:$0xff]  }
  0x37   :  { %951 = vmatpush1.bf16.msra.mxu0 %v1689_v30  ;;  %775 = vmatprep.subr.bf16.mxu1 %v1802_v0  ;;  %v1784_v30 = vld [vmem:[%s2371_s0 + $0x1e4] ss:$16 sps:$4 sm:$0xff]  }
  0x38   :  { %952 = vmatprep.subr.bf16.mxu0 %v1802_v0 }
  0x3a   :  { %776 = vmatpush1.bf16.msra.mxu1 %v1690_v31  ;;  %v1786_v31 = vld [vmem:[%s2371_s0 + $0x1ec] ss:$16 sps:$4 sm:$0xff]  }
  0x3b   :  { %953 = vmatpush1.bf16.msra.mxu0 %v1691_v32  ;;  %777 = vmatprep.subr.bf16.mxu1 %v1802_v0  ;;  %v1788_v32 = vld [vmem:[%s2371_s0 + $0x1e0] ss:$16 sps:$4 sm:$0xff]  }
  0x3c   :  { %954 = vmatprep.subr.bf16.mxu0 %v1802_v0  ;;  %v1740_v0 = vld [vmem:[%s2371_s0 + $0xe0] ss:$16 sps:$4 sm:$0xff]  }
  0x3e   :  { %778 = vmatpush1.bf16.msra.mxu1 %v1692_v34  ;;  %v1790_v34 = vld [vmem:[%s2371_s0 + $0x204] ss:$16 sps:$4 sm:$0xff]  }
  0x3f   :  { %955 = vmatpush1.bf16.msra.mxu0 %v745_v35  ;;  %v1792_v35 = vld [vmem:[%s2371_s0 + $0x20c] ss:$16 sps:$4 sm:$0xff]  }
  0x41   :  { %780 = vmatmul.mubr.bf16.vlgmr.msra.gmra.mrb[0].mxu1 %v1694_v36  ;;  %v1794_v36 = vld [vmem:[%s2371_s0 + $0x200] ss:$16 sps:$4 sm:$0xff]  }
  0x42   :  { %957 = vmatmul.mubr.bf16.vlgmr.msra.gmra.mrb[0].mxu0 %v1697_v37  ;;  %787 = vmatprep.mubr.bf16.mxu1 %v1700_v38  ;;  %v1795_v37 = vld [vmem:[%s2371_s0 + $0x208] ss:$16 sps:$4 sm:$0xff]   ;;  %v1796_v38 = vld [vmem:[%s2371_s0 + $0x224] ss:$16 sps:$4 sm:$0xff]  }
  0x43   :  { %1500 = vmatprep.mubr.msk.bf16.mxu0 %vm688_vm0, %v1702_v39  ;;  %v1798_v39 = vld [vmem:[%s2371_s0 + $0x22c] ss:$16 sps:$4 sm:$0xff]  }
  0x49   :  { %788 = vmatmul.mubr.bf16.gmra.mrb[4].mxu1 %v1704_v40  ;;  %v1800_v40 = vld [vmem:[%s2371_s0 + $0x220] ss:$16 sps:$4 sm:$0xff]  }
  0x4a   :  { %965 = vmatmul.mubr.bf16.gmra.mrb[4].mxu0 %v1705_v41  ;;  %795 = vmatprep.mubr.bf16.mxu1 %v1706_v42  ;;  %v1801_v41 = vld [vmem:[%s2371_s0 + $0x228] ss:$16 sps:$4 sm:$0xff]   ;;  %v2188_v42 = vld [vmem:[%s2372_s2] ss:$0 sm:$0xff] }
  0x4b   :  { %1501 = vmatprep.mubr.msk.bf16.mxu0 %vm688_vm0, %v1708_v43 }
  0x51   :  { %796 = vmatmul.mubr.bf16.gmra.mrb[8].mxu1 %v1710_v44 }
  0x52   :  { %973 = vmatmul.mubr.bf16.gmra.mrb[8].mxu0 %v1711_v45  ;;  %803 = vmatprep.mubr.bf16.mxu1 %v1712_v46 }
  0x53   :  { %1502 = vmatprep.mubr.msk.bf16.mxu0 %vm688_vm0, %v1714_v47 }
  0x59   :  { %804 = vmatmul.mubr.bf16.gmra.mrb[12].mxu1 %v1716_v48 }
  0x5a   :  { %981 = vmatmul.mubr.bf16.gmra.mrb[12].mxu0 %v1717_v49  ;;  %811 = vmatprep.mubr.bf16.mxu1 %v1718_v50 }
  0x5b   :  { %1503 = vmatprep.mubr.msk.bf16.mxu0 %vm688_vm0, %v1720_v51 }
  0x61   :  { %812 = vmatmul.mubr.bf16.gmra.mrb[16].mxu1 %v1722_v52 }
  0x62   :  { %989 = vmatmul.mubr.bf16.gmra.mrb[16].mxu0 %v1723_v53  ;;  %819 = vmatprep.mubr.bf16.mxu1 %v1724_v54 }
  0x63   :  { %1504 = vmatprep.mubr.msk.bf16.mxu0 %vm688_vm0, %v1726_v55 }
  0x69   :  { %820 = vmatmul.mubr.bf16.gmra.mrb[20].mxu1 %v1728_v56 }
  0x6a   :  { %997 = vmatmul.mubr.bf16.gmra.mrb[20].mxu0 %v1729_v57  ;;  %827 = vmatprep.mubr.bf16.mxu1 %v1730_v58 }
  0x6b   :  { %1505 = vmatprep.mubr.msk.bf16.mxu0 %vm688_vm0, %v1732_v59 }
  0x71   :  { %828 = vmatmul.mubr.bf16.gmra.mrb[24].mxu1 %v1734_v60 }
  0x72   :  { %1005 = vmatmul.mubr.bf16.gmra.mrb[24].mxu0 %v1735_v61  ;;  %835 = vmatprep.mubr.bf16.mxu1 %v1736_v62 }
  0x73   :  { %1506 = vmatprep.mubr.msk.bf16.mxu0 %vm688_vm0, %v1738_v63 }
  0x79   :  { %836 = vmatmul.mubr.bf16.gmra.mrb[28].mxu1 %v1740_v0 }
  0x7a   :  { %1013 = vmatmul.mubr.bf16.gmra.mrb[28].mxu0 %v1741_v1  ;;  %843 = vmatprep.mubr.bf16.mxu1 %v1742_v2 }
  0x7b   :  { %1507 = vmatprep.mubr.msk.bf16.mxu0 %vm688_vm0, %v1744_v3 }
  0x81   :  { %844 = vmatmul.mubr.bf16.gmra.mrb[32].mxu1 %v1746_v4 }
  0x82   :  { %1021 = vmatmul.mubr.bf16.gmra.mrb[32].mxu0 %v1747_v5  ;;  %851 = vmatprep.mubr.bf16.mxu1 %v1748_v6 }
  0x83   :  { %1508 = vmatprep.mubr.msk.bf16.mxu0 %vm688_vm0, %v1750_v7 }
  0x89   :  { %852 = vmatmul.mubr.bf16.gmra.mrb[36].mxu1 %v1752_v8 }
  0x8a   :  { %1029 = vmatmul.mubr.bf16.gmra.mrb[36].mxu0 %v1753_v9  ;;  %859 = vmatprep.mubr.bf16.mxu1 %v1754_v10 }
  0x8b   :  { %1509 = vmatprep.mubr.msk.bf16.mxu0 %vm688_vm0, %v1756_v11 }
  0x91   :  { %860 = vmatmul.mubr.bf16.gmra.mrb[40].mxu1 %v1758_v12 }
  0x92   :  { %1037 = vmatmul.mubr.bf16.gmra.mrb[40].mxu0 %v1759_v13  ;;  %867 = vmatprep.mubr.bf16.mxu1 %v1760_v14 }
  0x93   :  { %1510 = vmatprep.mubr.msk.bf16.mxu0 %vm688_vm0, %v1762_v15 }
  0x99   :  { %868 = vmatmul.mubr.bf16.gmra.mrb[44].mxu1 %v1764_v16 }
  0x9a   :  { %1045 = vmatmul.mubr.bf16.gmra.mrb[44].mxu0 %v1765_v17  ;;  %875 = vmatprep.mubr.bf16.mxu1 %v1766_v18 }
  0x9b   :  { %1511 = vmatprep.mubr.msk.bf16.mxu0 %vm688_vm0, %v1768_v19 }
  0xa1   :  { %876 = vmatmul.mubr.bf16.gmra.mrb[48].mxu1 %v1770_v20 }
  0xa2   :  { %1053 = vmatmul.mubr.bf16.gmra.mrb[48].mxu0 %v1771_v21  ;;  %883 = vmatprep.mubr.bf16.mxu1 %v1772_v22 }
  0xa3   :  { %1512 = vmatprep.mubr.msk.bf16.mxu0 %vm688_vm0, %v1774_v23 }
  0xa9   :  { %884 = vmatmul.mubr.bf16.gmra.mrb[52].mxu1 %v1776_v24 }
  0xaa   :  { %1061 = vmatmul.mubr.bf16.gmra.mrb[52].mxu0 %v1777_v25  ;;  %891 = vmatprep.mubr.bf16.mxu1 %v1778_v26 }
  0xab   :  { %1513 = vmatprep.mubr.msk.bf16.mxu0 %vm688_vm0, %v1780_v27 }
  0xb1   :  { %892 = vmatmul.mubr.bf16.gmra.mrb[56].mxu1 %v1782_v28 }
  0xb2   :  { %1069 = vmatmul.mubr.bf16.gmra.mrb[56].mxu0 %v1783_v29  ;;  %899 = vmatprep.mubr.bf16.mxu1 %v1784_v30 }
  0xb3   :  { %1514 = vmatprep.mubr.msk.bf16.mxu0 %vm688_vm0, %v1786_v31 }
  0xb9   :  { %900 = vmatmul.mubr.bf16.gmra.mrb[60].mxu1 %v1788_v32 }
  0xba   :  { %1077 = vmatmul.mubr.bf16.gmra.mrb[60].mxu0 %v1789_v33  ;;  %907 = vmatprep.mubr.bf16.mxu1 %v1790_v34 }
  0xbb   :  { %1515 = vmatprep.mubr.msk.bf16.mxu0 %vm688_vm0, %v1792_v35 }
  0xc1   :  { %908 = vmatmul.mubr.bf16.gmra.mrb[64].mxu1 %v1794_v36 }
  0xc2   :  { %1085 = vmatmul.mubr.bf16.gmra.mrb[64].mxu0 %v1795_v37  ;;  %915 = vmatprep.mubr.bf16.mxu1 %v1796_v38 }
  0xc3   :  { %1516 = vmatprep.mubr.msk.bf16.mxu0 %vm688_vm0, %v1798_v39 }
  0xc9   :  { %916 = vmatmul.mubr.bf16.gmra.mrb[68].mxu1 %v1800_v40 }
  0xca   :  { %1093 = vmatmul.mubr.bf16.gmra.mrb[68].mxu0 %v1801_v41 }
 0x114   :  { %v781_v43 = vpop.f32.mrb[0].mxu1 }
 0x115   :  { %v782_v44 = vadd.f32 %v2188_v42, %v781_v43  ;;  %v958_v45 = vpop.f32.mrb[0].mxu0  ;;  %v783_v46 = vpop.f32.mrb[1].mxu1 }
 0x116   :  { %v960_v47 = vpop.f32.mrb[1].mxu0  ;;  %v784_v48 = vpop.f32.mrb[2].mxu1 }
 0x117   :  { %v959_v49 = vadd.f32 %v958_v45, %v782_v44  ;;  %v785_v50 = vadd.f32 %v2188_v42, %v784_v48  ;;  %v961_v51 = vpop.f32.mrb[2].mxu0  ;;  %v786_v52 = vpop.f32.mrb[3].mxu1 }
 0x118   :  { %v963_v53 = vpop.f32.mrb[3].mxu0 }
 0x119   :  { %vm1101_vm2 = vcmp.gt.f32.partialorder %v959_v49, 0.0  ;;  %v1137_v54 = vmul.f32 0.1, %v959_v49  ;;  %v962_v55 = vadd.f32 %v961_v51, %v785_v50 }
 0x11b   :  { %v1173_v56 = vsel %vm1101_vm2, %v959_v49, %v1137_v54  ;;  %vm1102_vm4 = vcmp.gt.f32.partialorder %v962_v55, 0.0  ;;  %v1138_v57 = vmul.f32 0.1, %v962_v55 }
 0x11c   :  { %v1553_v58 = vpack.c.bf16 %v1173_v56, %v1173_v56  ;;  %v789_v59 = vpop.f32.mrb[4].mxu1 }
 0x11d   :  { %v1174_v60 = vsel %vm1102_vm4, %v962_v55, %v1138_v57  ;;  %v790_v61 = vadd.f32 %v2188_v42, %v789_v59  ;;  %v966_v62 = vpop.f32.mrb[4].mxu0  ;;  %v791_v63 = vpop.f32.mrb[5].mxu1 }
 0x11e   :  { %1354 = vst.msk [vmem:[%s2373_s3] sm:$0xf] %vm1353_vm3, %v1553_v58  ;;  %v1554_v0 = vpack.c.bf16 %v1174_v60, %v1174_v60  ;;  %v968_v1 = vpop.f32.mrb[5].mxu0  ;;  %v792_v2 = vpop.f32.mrb[6].mxu1 }
 0x11f   :  { %v967_v3 = vadd.f32 %v966_v62, %v790_v61  ;;  %v793_v4 = vadd.f32 %v2188_v42, %v792_v2  ;;  %v969_v5 = vpop.f32.mrb[6].mxu0  ;;  %v794_v6 = vpop.f32.mrb[7].mxu1 }
 0x120   :  { %1355 = vst.msk [vmem:[%s2373_s3 + $0x4] sm:$0xf] %vm1353_vm3, %v1554_v0  ;;  %v971_v7 = vpop.f32.mrb[7].mxu0 }
 0x121   :  { %vm1103_vm5 = vcmp.gt.f32.partialorder %v967_v3, 0.0  ;;  %v1139_v8 = vmul.f32 0.1, %v967_v3  ;;  %v970_v9 = vadd.f32 %v969_v5, %v793_v4 }
 0x123   :  { %v1175_v10 = vsel %vm1103_vm5, %v967_v3, %v1139_v8  ;;  %vm1104_vm6 = vcmp.gt.f32.partialorder %v970_v9, 0.0  ;;  %v1140_v11 = vmul.f32 0.1, %v970_v9 }
 0x124   :  { %v1555_v12 = vpack.c.bf16 %v1175_v10, %v1175_v10  ;;  %v797_v13 = vpop.f32.mrb[8].mxu1 }
 0x125   :  { %v1176_v14 = vsel %vm1104_vm6, %v970_v9, %v1140_v11  ;;  %v798_v15 = vadd.f32 %v2188_v42, %v797_v13  ;;  %v974_v16 = vpop.f32.mrb[8].mxu0  ;;  %v799_v17 = vpop.f32.mrb[9].mxu1 }
 0x126   :  { %1356 = vst.msk [vmem:[%s2373_s3 + $0x8] sm:$0xf] %vm1353_vm3, %v1555_v12  ;;  %v1556_v18 = vpack.c.bf16 %v1176_v14, %v1176_v14  ;;  %v976_v19 = vpop.f32.mrb[9].mxu0  ;;  %v800_v20 = vpop.f32.mrb[10].mxu1 }
 0x127   :  { %v975_v21 = vadd.f32 %v974_v16, %v798_v15  ;;  %v801_v22 = vadd.f32 %v2188_v42, %v800_v20  ;;  %v977_v23 = vpop.f32.mrb[10].mxu0  ;;  %v802_v24 = vpop.f32.mrb[11].mxu1 }
 0x128   :  { %1357 = vst.msk [vmem:[%s2373_s3 + $0xc] sm:$0xf] %vm1353_vm3, %v1556_v18  ;;  %v979_v25 = vpop.f32.mrb[11].mxu0 }
 0x129   :  { %vm1105_vm7 = vcmp.gt.f32.partialorder %v975_v21, 0.0  ;;  %v1141_v26 = vmul.f32 0.1, %v975_v21  ;;  %v978_v27 = vadd.f32 %v977_v23, %v801_v22 }
 0x12b   :  { %v1177_v28 = vsel %vm1105_vm7, %v975_v21, %v1141_v26  ;;  %vm1106_vm8 = vcmp.gt.f32.partialorder %v978_v27, 0.0  ;;  %v1142_v29 = vmul.f32 0.1, %v978_v27 }
 0x12c   :  { %v1557_v30 = vpack.c.bf16 %v1177_v28, %v1177_v28  ;;  %v805_v31 = vpop.f32.mrb[12].mxu1 }
 0x12d   :  { %v1178_v32 = vsel %vm1106_vm8, %v978_v27, %v1142_v29  ;;  %v806_v33 = vadd.f32 %v2188_v42, %v805_v31  ;;  %v982_v34 = vpop.f32.mrb[12].mxu0  ;;  %v807_v35 = vpop.f32.mrb[13].mxu1 }
 0x12e   :  { %1358 = vst.msk [vmem:[%s2373_s3 + $0x10] sm:$0xf] %vm1353_vm3, %v1557_v30  ;;  %v1558_v36 = vpack.c.bf16 %v1178_v32, %v1178_v32  ;;  %v984_v37 = vpop.f32.mrb[13].mxu0  ;;  %v808_v38 = vpop.f32.mrb[14].mxu1 }
 0x12f   :  { %v983_v39 = vadd.f32 %v982_v34, %v806_v33  ;;  %v809_v40 = vadd.f32 %v2188_v42, %v808_v38  ;;  %v985_v41 = vpop.f32.mrb[14].mxu0  ;;  %v810_v43 = vpop.f32.mrb[15].mxu1 }
 0x130   :  { %1359 = vst.msk [vmem:[%s2373_s3 + $0x14] sm:$0xf] %vm1353_vm3, %v1558_v36  ;;  %v987_v44 = vpop.f32.mrb[15].mxu0 }
 0x131   :  { %vm1107_vm9 = vcmp.gt.f32.partialorder %v983_v39, 0.0  ;;  %v1143_v45 = vmul.f32 0.1, %v983_v39  ;;  %v986_v46 = vadd.f32 %v985_v41, %v809_v40 }
 0x133   :  { %v1179_v47 = vsel %vm1107_vm9, %v983_v39, %v1143_v45  ;;  %vm1108_vm10 = vcmp.gt.f32.partialorder %v986_v46, 0.0  ;;  %v1144_v48 = vmul.f32 0.1, %v986_v46 }
 0x134   :  { %v1559_v49 = vpack.c.bf16 %v1179_v47, %v1179_v47  ;;  %v813_v50 = vpop.f32.mrb[16].mxu1 }
 0x135   :  { %v1180_v51 = vsel %vm1108_vm10, %v986_v46, %v1144_v48  ;;  %v814_v52 = vadd.f32 %v2188_v42, %v813_v50  ;;  %v990_v53 = vpop.f32.mrb[16].mxu0  ;;  %v815_v54 = vpop.f32.mrb[17].mxu1 }
 0x136   :  { %1360 = vst.msk [vmem:[%s2373_s3 + $0x18] sm:$0xf] %vm1353_vm3, %v1559_v49  ;;  %v1560_v55 = vpack.c.bf16 %v1180_v51, %v1180_v51  ;;  %v992_v56 = vpop.f32.mrb[17].mxu0  ;;  %v816_v57 = vpop.f32.mrb[18].mxu1 }
 0x137   :  { %v991_v58 = vadd.f32 %v990_v53, %v814_v52  ;;  %v817_v59 = vadd.f32 %v2188_v42, %v816_v57  ;;  %v993_v60 = vpop.f32.mrb[18].mxu0  ;;  %v818_v61 = vpop.f32.mrb[19].mxu1 }
 0x138   :  { %1361 = vst.msk [vmem:[%s2373_s3 + $0x1c] sm:$0xf] %vm1353_vm3, %v1560_v55  ;;  %v995_v62 = vpop.f32.mrb[19].mxu0 }
 0x139   :  { %vm1109_vm11 = vcmp.gt.f32.partialorder %v991_v58, 0.0  ;;  %v1145_v63 = vmul.f32 0.1, %v991_v58  ;;  %v994_v0 = vadd.f32 %v993_v60, %v817_v59 }
 0x13b   :  { %v1181_v1 = vsel %vm1109_vm11, %v991_v58, %v1145_v63  ;;  %vm1110_vm12 = vcmp.gt.f32.partialorder %v994_v0, 0.0  ;;  %v1146_v2 = vmul.f32 0.1, %v994_v0 }
 0x13c   :  { %v1561_v3 = vpack.c.bf16 %v1181_v1, %v1181_v1  ;;  %v821_v4 = vpop.f32.mrb[20].mxu1 }
 0x13d   :  { %v1182_v5 = vsel %vm1110_vm12, %v994_v0, %v1146_v2  ;;  %v822_v6 = vadd.f32 %v2188_v42, %v821_v4  ;;  %v998_v7 = vpop.f32.mrb[20].mxu0  ;;  %v823_v8 = vpop.f32.mrb[21].mxu1 }
 0x13e   :  { %1362 = vst.msk [vmem:[%s2373_s3 + $0x20] sm:$0xf] %vm1353_vm3, %v1561_v3  ;;  %v1562_v9 = vpack.c.bf16 %v1182_v5, %v1182_v5  ;;  %v1000_v10 = vpop.f32.mrb[21].mxu0  ;;  %v824_v11 = vpop.f32.mrb[22].mxu1 }
 0x13f   :  { %v999_v12 = vadd.f32 %v998_v7, %v822_v6  ;;  %v825_v13 = vadd.f32 %v2188_v42, %v824_v11  ;;  %v1001_v14 = vpop.f32.mrb[22].mxu0  ;;  %v826_v15 = vpop.f32.mrb[23].mxu1 }
 0x140   :  { %1363 = vst.msk [vmem:[%s2373_s3 + $0x24] sm:$0xf] %vm1353_vm3, %v1562_v9  ;;  %v1003_v16 = vpop.f32.mrb[23].mxu0 }
 0x141   :  { %vm1111_vm13 = vcmp.gt.f32.partialorder %v999_v12, 0.0  ;;  %v1147_v17 = vmul.f32 0.1, %v999_v12  ;;  %v1002_v18 = vadd.f32 %v1001_v14, %v825_v13 }
 0x143   :  { %v1183_v19 = vsel %vm1111_vm13, %v999_v12, %v1147_v17  ;;  %vm1112_vm14 = vcmp.gt.f32.partialorder %v1002_v18, 0.0  ;;  %v1148_v20 = vmul.f32 0.1, %v1002_v18 }
 0x144   :  { %v1563_v21 = vpack.c.bf16 %v1183_v19, %v1183_v19  ;;  %v829_v22 = vpop.f32.mrb[24].mxu1 }
 0x145   :  { %v1184_v23 = vsel %vm1112_vm14, %v1002_v18, %v1148_v20  ;;  %v830_v24 = vadd.f32 %v2188_v42, %v829_v22  ;;  %v1006_v25 = vpop.f32.mrb[24].mxu0  ;;  %v831_v26 = vpop.f32.mrb[25].mxu1 }
 0x146   :  { %1364 = vst.msk [vmem:[%s2373_s3 + $0x28] sm:$0xf] %vm1353_vm3, %v1563_v21  ;;  %v1564_v27 = vpack.c.bf16 %v1184_v23, %v1184_v23  ;;  %v1008_v28 = vpop.f32.mrb[25].mxu0  ;;  %v832_v29 = vpop.f32.mrb[26].mxu1 }
 0x147   :  { %v1007_v30 = vadd.f32 %v1006_v25, %v830_v24  ;;  %v833_v31 = vadd.f32 %v2188_v42, %v832_v29  ;;  %v1009_v32 = vpop.f32.mrb[26].mxu0  ;;  %v834_v33 = vpop.f32.mrb[27].mxu1 }
 0x148   :  { %1365 = vst.msk [vmem:[%s2373_s3 + $0x2c] sm:$0xf] %vm1353_vm3, %v1564_v27  ;;  %v1011_v34 = vpop.f32.mrb[27].mxu0 }
 0x149   :  { %vm1113_vm15 = vcmp.gt.f32.partialorder %v1007_v30, 0.0  ;;  %v1149_v35 = vmul.f32 0.1, %v1007_v30  ;;  %v1010_v36 = vadd.f32 %v1009_v32, %v833_v31 }
 0x14b   :  { %v1185_v37 = vsel %vm1113_vm15, %v1007_v30, %v1149_v35  ;;  %vm1114_vm0 = vcmp.gt.f32.partialorder %v1010_v36, 0.0  ;;  %v1150_v38 = vmul.f32 0.1, %v1010_v36 }
 0x14c   :  { %v1565_v39 = vpack.c.bf16 %v1185_v37, %v1185_v37  ;;  %v837_v40 = vpop.f32.mrb[28].mxu1 }
 0x14d   :  { %v1186_v41 = vsel %vm1114_vm0, %v1010_v36, %v1150_v38  ;;  %v838_v43 = vadd.f32 %v2188_v42, %v837_v40  ;;  %v1014_v44 = vpop.f32.mrb[28].mxu0  ;;  %v839_v45 = vpop.f32.mrb[29].mxu1 }
 0x14e   :  { %1366 = vst.msk [vmem:[%s2373_s3 + $0x30] sm:$0xf] %vm1353_vm3, %v1565_v39  ;;  %v1566_v46 = vpack.c.bf16 %v1186_v41, %v1186_v41  ;;  %v1016_v47 = vpop.f32.mrb[29].mxu0  ;;  %v840_v48 = vpop.f32.mrb[30].mxu1 }
 0x14f   :  { %v1015_v49 = vadd.f32 %v1014_v44, %v838_v43  ;;  %v841_v50 = vadd.f32 %v2188_v42, %v840_v48  ;;  %v1017_v51 = vpop.f32.mrb[30].mxu0  ;;  %v842_v52 = vpop.f32.mrb[31].mxu1 }
 0x150   :  { %1367 = vst.msk [vmem:[%s2373_s3 + $0x34] sm:$0xf] %vm1353_vm3, %v1566_v46  ;;  %v1019_v53 = vpop.f32.mrb[31].mxu0 }
 0x151   :  { %vm1115_vm1 = vcmp.gt.f32.partialorder %v1015_v49, 0.0  ;;  %v1151_v54 = vmul.f32 0.1, %v1015_v49  ;;  %v1018_v55 = vadd.f32 %v1017_v51, %v841_v50 }
 0x153   :  { %v1187_v56 = vsel %vm1115_vm1, %v1015_v49, %v1151_v54  ;;  %vm1116_vm2 = vcmp.gt.f32.partialorder %v1018_v55, 0.0  ;;  %v1152_v57 = vmul.f32 0.1, %v1018_v55 }
 0x154   :  { %v1567_v58 = vpack.c.bf16 %v1187_v56, %v1187_v56  ;;  %v845_v59 = vpop.f32.mrb[32].mxu1 }
 0x155   :  { %v1188_v60 = vsel %vm1116_vm2, %v1018_v55, %v1152_v57  ;;  %v846_v61 = vadd.f32 %v2188_v42, %v845_v59  ;;  %v1022_v62 = vpop.f32.mrb[32].mxu0  ;;  %v847_v63 = vpop.f32.mrb[33].mxu1 }
 0x156   :  { %1368 = vst.msk [vmem:[%s2373_s3 + $0x38] sm:$0xf] %vm1353_vm3, %v1567_v58  ;;  %v1568_v0 = vpack.c.bf16 %v1188_v60, %v1188_v60  ;;  %v1024_v1 = vpop.f32.mrb[33].mxu0  ;;  %v848_v2 = vpop.f32.mrb[34].mxu1 }
 0x157   :  { %v1023_v3 = vadd.f32 %v1022_v62, %v846_v61  ;;  %v849_v4 = vadd.f32 %v2188_v42, %v848_v2  ;;  %v1025_v5 = vpop.f32.mrb[34].mxu0  ;;  %v850_v6 = vpop.f32.mrb[35].mxu1 }
 0x158   :  { %1369 = vst.msk [vmem:[%s2373_s3 + $0x3c] sm:$0xf] %vm1353_vm3, %v1568_v0  ;;  %v1027_v7 = vpop.f32.mrb[35].mxu0 }
 0x159   :  { %vm1117_vm4 = vcmp.gt.f32.partialorder %v1023_v3, 0.0  ;;  %v1153_v8 = vmul.f32 0.1, %v1023_v3  ;;  %v1026_v9 = vadd.f32 %v1025_v5, %v849_v4 }
 0x15b   :  { %v1189_v10 = vsel %vm1117_vm4, %v1023_v3, %v1153_v8  ;;  %vm1118_vm5 = vcmp.gt.f32.partialorder %v1026_v9, 0.0  ;;  %v1154_v11 = vmul.f32 0.1, %v1026_v9 }
 0x15c   :  { %v1569_v12 = vpack.c.bf16 %v1189_v10, %v1189_v10  ;;  %v853_v13 = vpop.f32.mrb[36].mxu1 }
 0x15d   :  { %v1190_v14 = vsel %vm1118_vm5, %v1026_v9, %v1154_v11  ;;  %v854_v15 = vadd.f32 %v2188_v42, %v853_v13  ;;  %v1030_v16 = vpop.f32.mrb[36].mxu0  ;;  %v855_v17 = vpop.f32.mrb[37].mxu1 }
 0x15e   :  { %1370 = vst.msk [vmem:[%s2373_s3 + $0x40] sm:$0xf] %vm1353_vm3, %v1569_v12  ;;  %v1570_v18 = vpack.c.bf16 %v1190_v14, %v1190_v14  ;;  %v1032_v19 = vpop.f32.mrb[37].mxu0  ;;  %v856_v20 = vpop.f32.mrb[38].mxu1 }
 0x15f   :  { %v1031_v21 = vadd.f32 %v1030_v16, %v854_v15  ;;  %v857_v22 = vadd.f32 %v2188_v42, %v856_v20  ;;  %v1033_v23 = vpop.f32.mrb[38].mxu0  ;;  %v858_v24 = vpop.f32.mrb[39].mxu1 }
 0x160   :  { %1371 = vst.msk [vmem:[%s2373_s3 + $0x44] sm:$0xf] %vm1353_vm3, %v1570_v18  ;;  %v1035_v25 = vpop.f32.mrb[39].mxu0 }
 0x161   :  { %vm1119_vm6 = vcmp.gt.f32.partialorder %v1031_v21, 0.0  ;;  %v1155_v26 = vmul.f32 0.1, %v1031_v21  ;;  %v1034_v27 = vadd.f32 %v1033_v23, %v857_v22 }
 0x163   :  { %v1191_v28 = vsel %vm1119_vm6, %v1031_v21, %v1155_v26  ;;  %vm1120_vm7 = vcmp.gt.f32.partialorder %v1034_v27, 0.0  ;;  %v1156_v29 = vmul.f32 0.1, %v1034_v27 }
 0x164   :  { %v1571_v30 = vpack.c.bf16 %v1191_v28, %v1191_v28  ;;  %v861_v31 = vpop.f32.mrb[40].mxu1 }
 0x165   :  { %v1192_v32 = vsel %vm1120_vm7, %v1034_v27, %v1156_v29  ;;  %v862_v33 = vadd.f32 %v2188_v42, %v861_v31  ;;  %v1038_v34 = vpop.f32.mrb[40].mxu0  ;;  %v863_v35 = vpop.f32.mrb[41].mxu1 }
 0x166   :  { %1372 = vst.msk [vmem:[%s2373_s3 + $0x48] sm:$0xf] %vm1353_vm3, %v1571_v30  ;;  %v1572_v36 = vpack.c.bf16 %v1192_v32, %v1192_v32  ;;  %v1040_v37 = vpop.f32.mrb[41].mxu0  ;;  %v864_v38 = vpop.f32.mrb[42].mxu1 }
 0x167   :  { %v1039_v39 = vadd.f32 %v1038_v34, %v862_v33  ;;  %v865_v40 = vadd.f32 %v2188_v42, %v864_v38  ;;  %v1041_v41 = vpop.f32.mrb[42].mxu0  ;;  %v866_v43 = vpop.f32.mrb[43].mxu1 }
 0x168   :  { %1373 = vst.msk [vmem:[%s2373_s3 + $0x4c] sm:$0xf] %vm1353_vm3, %v1572_v36  ;;  %v1043_v44 = vpop.f32.mrb[43].mxu0 }
 0x169   :  { %vm1121_vm8 = vcmp.gt.f32.partialorder %v1039_v39, 0.0  ;;  %v1157_v45 = vmul.f32 0.1, %v1039_v39  ;;  %v1042_v46 = vadd.f32 %v1041_v41, %v865_v40 }
 0x16b   :  { %v1193_v47 = vsel %vm1121_vm8, %v1039_v39, %v1157_v45  ;;  %vm1122_vm9 = vcmp.gt.f32.partialorder %v1042_v46, 0.0  ;;  %v1158_v48 = vmul.f32 0.1, %v1042_v46 }
 0x16c   :  { %v1573_v49 = vpack.c.bf16 %v1193_v47, %v1193_v47  ;;  %v869_v50 = vpop.f32.mrb[44].mxu1 }
 0x16d   :  { %v1194_v51 = vsel %vm1122_vm9, %v1042_v46, %v1158_v48  ;;  %v870_v52 = vadd.f32 %v2188_v42, %v869_v50  ;;  %v1046_v53 = vpop.f32.mrb[44].mxu0  ;;  %v871_v54 = vpop.f32.mrb[45].mxu1 }
 0x16e   :  { %1374 = vst.msk [vmem:[%s2373_s3 + $0x50] sm:$0xf] %vm1353_vm3, %v1573_v49  ;;  %v1574_v55 = vpack.c.bf16 %v1194_v51, %v1194_v51  ;;  %v1048_v56 = vpop.f32.mrb[45].mxu0  ;;  %v872_v57 = vpop.f32.mrb[46].mxu1 }
 0x16f   :  { %v1047_v58 = vadd.f32 %v1046_v53, %v870_v52  ;;  %v873_v59 = vadd.f32 %v2188_v42, %v872_v57  ;;  %v1049_v60 = vpop.f32.mrb[46].mxu0  ;;  %v874_v61 = vpop.f32.mrb[47].mxu1 }
 0x170   :  { %1375 = vst.msk [vmem:[%s2373_s3 + $0x54] sm:$0xf] %vm1353_vm3, %v1574_v55  ;;  %v1051_v62 = vpop.f32.mrb[47].mxu0 }
 0x171   :  { %vm1123_vm10 = vcmp.gt.f32.partialorder %v1047_v58, 0.0  ;;  %v1159_v63 = vmul.f32 0.1, %v1047_v58  ;;  %v1050_v0 = vadd.f32 %v1049_v60, %v873_v59 }
 0x173   :  { %v1195_v1 = vsel %vm1123_vm10, %v1047_v58, %v1159_v63  ;;  %vm1124_vm11 = vcmp.gt.f32.partialorder %v1050_v0, 0.0  ;;  %v1160_v2 = vmul.f32 0.1, %v1050_v0 }
 0x174   :  { %v1575_v3 = vpack.c.bf16 %v1195_v1, %v1195_v1  ;;  %v877_v4 = vpop.f32.mrb[48].mxu1 }
 0x175   :  { %v1196_v5 = vsel %vm1124_vm11, %v1050_v0, %v1160_v2  ;;  %v878_v6 = vadd.f32 %v2188_v42, %v877_v4  ;;  %v1054_v7 = vpop.f32.mrb[48].mxu0  ;;  %v879_v8 = vpop.f32.mrb[49].mxu1 }
 0x176   :  { %1376 = vst.msk [vmem:[%s2373_s3 + $0x58] sm:$0xf] %vm1353_vm3, %v1575_v3  ;;  %v1576_v9 = vpack.c.bf16 %v1196_v5, %v1196_v5  ;;  %v1056_v10 = vpop.f32.mrb[49].mxu0  ;;  %v880_v11 = vpop.f32.mrb[50].mxu1 }
 0x177   :  { %v1055_v12 = vadd.f32 %v1054_v7, %v878_v6  ;;  %v881_v13 = vadd.f32 %v2188_v42, %v880_v11  ;;  %v1057_v14 = vpop.f32.mrb[50].mxu0  ;;  %v882_v15 = vpop.f32.mrb[51].mxu1 }
 0x178   :  { %1377 = vst.msk [vmem:[%s2373_s3 + $0x5c] sm:$0xf] %vm1353_vm3, %v1576_v9  ;;  %v1059_v16 = vpop.f32.mrb[51].mxu0 }
 0x179   :  { %vm1125_vm12 = vcmp.gt.f32.partialorder %v1055_v12, 0.0  ;;  %v1161_v17 = vmul.f32 0.1, %v1055_v12  ;;  %v1058_v18 = vadd.f32 %v1057_v14, %v881_v13 }
 0x17b   :  { %v1197_v19 = vsel %vm1125_vm12, %v1055_v12, %v1161_v17  ;;  %vm1126_vm13 = vcmp.gt.f32.partialorder %v1058_v18, 0.0  ;;  %v1162_v20 = vmul.f32 0.1, %v1058_v18 }
 0x17c   :  { %v1577_v21 = vpack.c.bf16 %v1197_v19, %v1197_v19  ;;  %v885_v22 = vpop.f32.mrb[52].mxu1 }
 0x17d   :  { %v1198_v23 = vsel %vm1126_vm13, %v1058_v18, %v1162_v20  ;;  %v886_v24 = vadd.f32 %v2188_v42, %v885_v22  ;;  %v1062_v25 = vpop.f32.mrb[52].mxu0  ;;  %v887_v26 = vpop.f32.mrb[53].mxu1 }
 0x17e   :  { %1378 = vst.msk [vmem:[%s2373_s3 + $0x60] sm:$0xf] %vm1353_vm3, %v1577_v21  ;;  %v1578_v27 = vpack.c.bf16 %v1198_v23, %v1198_v23  ;;  %v1064_v28 = vpop.f32.mrb[53].mxu0  ;;  %v888_v29 = vpop.f32.mrb[54].mxu1 }
 0x17f   :  { %v1063_v30 = vadd.f32 %v1062_v25, %v886_v24  ;;  %v889_v31 = vadd.f32 %v2188_v42, %v888_v29  ;;  %v1065_v32 = vpop.f32.mrb[54].mxu0  ;;  %v890_v33 = vpop.f32.mrb[55].mxu1 }
 0x180   :  { %1379 = vst.msk [vmem:[%s2373_s3 + $0x64] sm:$0xf] %vm1353_vm3, %v1578_v27  ;;  %v1067_v34 = vpop.f32.mrb[55].mxu0 }
 0x181   :  { %vm1127_vm14 = vcmp.gt.f32.partialorder %v1063_v30, 0.0  ;;  %v1163_v35 = vmul.f32 0.1, %v1063_v30  ;;  %v1066_v36 = vadd.f32 %v1065_v32, %v889_v31 }
 0x183   :  { %v1199_v37 = vsel %vm1127_vm14, %v1063_v30, %v1163_v35  ;;  %vm1128_vm15 = vcmp.gt.f32.partialorder %v1066_v36, 0.0  ;;  %v1164_v38 = vmul.f32 0.1, %v1066_v36 }
 0x184   :  { %v1579_v39 = vpack.c.bf16 %v1199_v37, %v1199_v37  ;;  %v893_v40 = vpop.f32.mrb[56].mxu1 }
 0x185   :  { %v1200_v41 = vsel %vm1128_vm15, %v1066_v36, %v1164_v38  ;;  %v894_v43 = vadd.f32 %v2188_v42, %v893_v40  ;;  %v1070_v44 = vpop.f32.mrb[56].mxu0  ;;  %v895_v45 = vpop.f32.mrb[57].mxu1 }
 0x186   :  { %1380 = vst.msk [vmem:[%s2373_s3 + $0x68] sm:$0xf] %vm1353_vm3, %v1579_v39  ;;  %v1580_v46 = vpack.c.bf16 %v1200_v41, %v1200_v41  ;;  %v1072_v47 = vpop.f32.mrb[57].mxu0  ;;  %v896_v48 = vpop.f32.mrb[58].mxu1 }
 0x187   :  { %v1071_v49 = vadd.f32 %v1070_v44, %v894_v43  ;;  %v897_v50 = vadd.f32 %v2188_v42, %v896_v48  ;;  %v1073_v51 = vpop.f32.mrb[58].mxu0  ;;  %v898_v52 = vpop.f32.mrb[59].mxu1 }
 0x188   :  { %1381 = vst.msk [vmem:[%s2373_s3 + $0x6c] sm:$0xf] %vm1353_vm3, %v1580_v46  ;;  %v1075_v53 = vpop.f32.mrb[59].mxu0 }
 0x189   :  { %vm1129_vm0 = vcmp.gt.f32.partialorder %v1071_v49, 0.0  ;;  %v1165_v54 = vmul.f32 0.1, %v1071_v49  ;;  %v1074_v55 = vadd.f32 %v1073_v51, %v897_v50 }
 0x18b   :  { %v1201_v56 = vsel %vm1129_vm0, %v1071_v49, %v1165_v54  ;;  %vm1130_vm1 = vcmp.gt.f32.partialorder %v1074_v55, 0.0  ;;  %v1166_v57 = vmul.f32 0.1, %v1074_v55 }
 0x18c   :  { %v1581_v58 = vpack.c.bf16 %v1201_v56, %v1201_v56  ;;  %v901_v59 = vpop.f32.mrb[60].mxu1 }
 0x18d   :  { %v1202_v60 = vsel %vm1130_vm1, %v1074_v55, %v1166_v57  ;;  %v902_v61 = vadd.f32 %v2188_v42, %v901_v59  ;;  %v1078_v62 = vpop.f32.mrb[60].mxu0  ;;  %v903_v63 = vpop.f32.mrb[61].mxu1 }
 0x18e   :  { %1382 = vst.msk [vmem:[%s2373_s3 + $0x70] sm:$0xf] %vm1353_vm3, %v1581_v58  ;;  %v1582_v0 = vpack.c.bf16 %v1202_v60, %v1202_v60  ;;  %v1080_v1 = vpop.f32.mrb[61].mxu0  ;;  %v904_v2 = vpop.f32.mrb[62].mxu1 }
 0x18f   :  { %v1079_v3 = vadd.f32 %v1078_v62, %v902_v61  ;;  %v905_v4 = vadd.f32 %v2188_v42, %v904_v2  ;;  %v1081_v5 = vpop.f32.mrb[62].mxu0  ;;  %v906_v6 = vpop.f32.mrb[63].mxu1 }
 0x190   :  { %1383 = vst.msk [vmem:[%s2373_s3 + $0x74] sm:$0xf] %vm1353_vm3, %v1582_v0  ;;  %v1083_v7 = vpop.f32.mrb[63].mxu0 }
 0x191   :  { %vm1131_vm2 = vcmp.gt.f32.partialorder %v1079_v3, 0.0  ;;  %v1167_v8 = vmul.f32 0.1, %v1079_v3  ;;  %v1082_v9 = vadd.f32 %v1081_v5, %v905_v4 }
 0x193   :  { %v1203_v10 = vsel %vm1131_vm2, %v1079_v3, %v1167_v8  ;;  %vm1132_vm4 = vcmp.gt.f32.partialorder %v1082_v9, 0.0  ;;  %v1168_v11 = vmul.f32 0.1, %v1082_v9 }
 0x194   :  { %v1583_v12 = vpack.c.bf16 %v1203_v10, %v1203_v10  ;;  %v909_v13 = vpop.f32.mrb[64].mxu1 }
 0x195   :  { %v1204_v14 = vsel %vm1132_vm4, %v1082_v9, %v1168_v11  ;;  %v910_v15 = vadd.f32 %v2188_v42, %v909_v13  ;;  %v1086_v16 = vpop.f32.mrb[64].mxu0  ;;  %v911_v17 = vpop.f32.mrb[65].mxu1 }
 0x196   :  { %1384 = vst.msk [vmem:[%s2373_s3 + $0x78] sm:$0xf] %vm1353_vm3, %v1583_v12  ;;  %v1584_v18 = vpack.c.bf16 %v1204_v14, %v1204_v14  ;;  %v1088_v19 = vpop.f32.mrb[65].mxu0  ;;  %v912_v20 = vpop.f32.mrb[66].mxu1 }
 0x197   :  { %v1087_v21 = vadd.f32 %v1086_v16, %v910_v15  ;;  %v913_v22 = vadd.f32 %v2188_v42, %v912_v20  ;;  %v1089_v23 = vpop.f32.mrb[66].mxu0  ;;  %v914_v24 = vpop.f32.mrb[67].mxu1 }
 0x198   :  { %1385 = vst.msk [vmem:[%s2373_s3 + $0x7c] sm:$0xf] %vm1353_vm3, %v1584_v18  ;;  %v1091_v25 = vpop.f32.mrb[67].mxu0 }
 0x199   :  { %vm1133_vm5 = vcmp.gt.f32.partialorder %v1087_v21, 0.0  ;;  %v1169_v26 = vmul.f32 0.1, %v1087_v21  ;;  %v1090_v27 = vadd.f32 %v1089_v23, %v913_v22 }
 0x19b   :  { %v1205_v28 = vsel %vm1133_vm5, %v1087_v21, %v1169_v26  ;;  %vm1134_vm6 = vcmp.gt.f32.partialorder %v1090_v27, 0.0  ;;  %v1170_v29 = vmul.f32 0.1, %v1090_v27 }
 0x19c   :  { %v1585_v30 = vpack.c.bf16 %v1205_v28, %v1205_v28  ;;  %v917_v31 = vpop.f32.mrb[68].mxu1 }
 0x19d   :  { %v1206_v32 = vsel %vm1134_vm6, %v1090_v27, %v1170_v29  ;;  %v918_v33 = vadd.f32 %v2188_v42, %v917_v31  ;;  %v1094_v34 = vpop.f32.mrb[68].mxu0  ;;  %v919_v35 = vpop.f32.mrb[69].mxu1 }
 0x19e   :  { %1386 = vst.msk [vmem:[%s2373_s3 + $0x80] sm:$0xf] %vm1353_vm3, %v1585_v30  ;;  %v1586_v36 = vpack.c.bf16 %v1206_v32, %v1206_v32  ;;  %v1096_v37 = vpop.f32.mrb[69].mxu0  ;;  %v920_v38 = vpop.f32.mrb[70].mxu1 }
 0x19f   :  { %v1095_v39 = vadd.f32 %v1094_v34, %v918_v33  ;;  %v921_v40 = vadd.f32 %v2188_v42, %v920_v38  ;;  %v1097_v41 = vpop.f32.mrb[70].mxu0  ;;  %v922_v43 = vpop.f32.mrb[71].mxu1 }
 0x1a0   :  { %1387 = vst.msk [vmem:[%s2373_s3 + $0x84] sm:$0xf] %vm1353_vm3, %v1586_v36  ;;  %v1099_v44 = vpop.f32.mrb[71].mxu0 }
 0x1a1   :  { %vm1135_vm7 = vcmp.gt.f32.partialorder %v1095_v39, 0.0  ;;  %v1171_v45 = vmul.f32 0.1, %v1095_v39  ;;  %v1098_v46 = vadd.f32 %v1097_v41, %v921_v40 }
 0x1a3   :  { %v1207_v47 = vsel %vm1135_vm7, %v1095_v39, %v1171_v45  ;;  %vm1136_vm8 = vcmp.gt.f32.partialorder %v1098_v46, 0.0  ;;  %v1172_v48 = vmul.f32 0.1, %v1098_v46 }
 0x1a4   :  { %v1587_v49 = vpack.c.bf16 %v1207_v47, %v1207_v47 }
 0x1a5   :  { %v1208_v50 = vsel %vm1136_vm8, %v1098_v46, %v1172_v48 }
 0x1a6   :  { %1388 = vst.msk [vmem:[%s2373_s3 + $0x88] sm:$0xf] %vm1353_vm3, %v1587_v49  ;;  %v1588_v42 = vpack.c.bf16 %v1208_v50, %v1208_v50 }
 0x1a8   :  { %1389 = vst.msk [vmem:[%s2373_s3 + $0x8c] sm:$0xf] %vm1353_vm3, %v1588_v42 }

// kernel: voxnet_encoder_forward.5
= control target key start
LH: loop header
LB: loop body
LE: loop exit
PB: predicated region body
PF: predicated region fallthrough
CT: control target
= control target key end

     0   :  { %vm626_vm0 = vcmask 785408   ;;  %vm955_vm2 = vcmask 257024   ;;  %s1638_s1 = inlined_call_operand.vmem [shape: bf16[864,32], index: 1, kind: input, shape index: {}]   ;;  %s1639_s0 = inlined_call_operand.vmem [shape: bf16[64,864], index: 0, kind: input, shape index: {}]   ;;  %s1640_s2 = inlined_call_operand.vmem [shape: f32[1,32], index: 2, kind: input, shape index: {}]   ;;  %s1641_s3 = inlined_call_operand.vmem [shape: bf16[64,32], index: 3, kind: output, shape index: {}]  }
   0x1   :  { %v1221_v0 = vld [vmem:[%s1638_s1 + $0x40] sm:$0xff]   ;;  %v1225_v4 = vld [vmem:[%s1638_s1 + $0x48] sm:$0xff]   ;;  %v1229_v8 = vld [vmem:[%s1638_s1 + $0x50] sm:$0xff]  }
   0x2   :  { %v1222_v1 = vld [vmem:[%s1638_s1] sm:$0xff]   ;;  %1071 = vmatprep.subr.bf16.mxu0 %v1221_v0  ;;  %v1226_v5 = vld [vmem:[%s1638_s1 + $0x8] sm:$0xff]   ;;  %v1230_v9 = vld [vmem:[%s1638_s1 + $0x10] sm:$0xff]  }
   0x3   :  { %v1223_v2 = vld [vmem:[%s1638_s1 + $0xc0] sm:$0xff]   ;;  %1072 = vmatpush3.bf16.msra.mxu0 %v1222_v1  ;;  %v1227_v6 = vld [vmem:[%s1638_s1 + $0xc8] sm:$0xff]   ;;  %v1231_v10 = vld [vmem:[%s1638_s1 + $0xd0] sm:$0xff]  }
   0x4   :  { %v1224_v3 = vld [vmem:[%s1638_s1 + $0x80] sm:$0xff]   ;;  %1111 = vmatprep.subr.bf16.mxu1 %v1223_v2  ;;  %1073 = vmatprep.subr.bf16.mxu0 %v1225_v4  ;;  %v1228_v7 = vld [vmem:[%s1638_s1 + $0x88] sm:$0xff]   ;;  %v1232_v11 = vld [vmem:[%s1638_s1 + $0x90] sm:$0xff]  }
   0x5   :  { %1112 = vmatpush3.bf16.msra.mxu1 %v1224_v3  ;;  %v1233_v12 = vld [vmem:[%s1638_s1 + $0x58] sm:$0xff]   ;;  %v1237_v16 = vld [vmem:[%s1638_s1 + $0x60] sm:$0xff]   ;;  %v1241_v20 = vld [vmem:[%s1638_s1 + $0x68] sm:$0xff]  }
   0x6   :  { %1113 = vmatprep.subr.bf16.mxu1 %v1227_v6  ;;  %v1234_v13 = vld [vmem:[%s1638_s1 + $0x18] sm:$0xff]   ;;  %v1238_v17 = vld [vmem:[%s1638_s1 + $0x20] sm:$0xff]   ;;  %v1242_v21 = vld [vmem:[%s1638_s1 + $0x28] sm:$0xff]  }
   0x7   :  { %1074 = vmatpush3.bf16.msra.mxu0 %v1226_v5  ;;  %v1235_v14 = vld [vmem:[%s1638_s1 + $0xd8] sm:$0xff]   ;;  %v1239_v18 = vld [vmem:[%s1638_s1 + $0xe0] sm:$0xff]   ;;  %v1243_v22 = vld [vmem:[%s1638_s1 + $0xe8] sm:$0xff]  }
   0x8   :  { %1075 = vmatprep.subr.bf16.mxu0 %v1229_v8  ;;  %v1236_v15 = vld [vmem:[%s1638_s1 + $0x98] sm:$0xff]   ;;  %v1240_v19 = vld [vmem:[%s1638_s1 + $0xa0] sm:$0xff]   ;;  %v1244_v23 = vld [vmem:[%s1638_s1 + $0xa8] sm:$0xff]  }
   0x9   :  { %1114 = vmatpush3.bf16.msra.mxu1 %v1228_v7  ;;  %v1245_v24 = vld [vmem:[%s1638_s1 + $0x70] sm:$0xff]   ;;  %v1249_v28 = vld [vmem:[%s1638_s1 + $0x78] sm:$0xff]   ;;  %v1254_v32 = vld [vmem:[%s1639_s0 + $0x4] ss:$28 sps:$4 sm:$0xff]  }
   0xa   :  { %1115 = vmatprep.subr.bf16.mxu1 %v1231_v10  ;;  %v1246_v25 = vld [vmem:[%s1638_s1 + $0x30] sm:$0xff]   ;;  %v1250_v29 = vld [vmem:[%s1638_s1 + $0x38] sm:$0xff]   ;;  %671 = vmatprep.mubr.bf16.mxu0 %v1254_v32  ;;  %v1256_v34 = vld [vmem:[%s1638_s1 + $0x140] sm:$0xff]  }
   0xb   :  { %1076 = vmatpush3.bf16.msra.mxu0 %v1230_v9  ;;  %v1247_v26 = vld [vmem:[%s1638_s1 + $0xf0] sm:$0xff]   ;;  %v1251_v30 = vld [vmem:[%s1638_s1 + $0xf8] sm:$0xff]   ;;  %v1257_v35 = vld [vmem:[%s1639_s0 + $0x8] ss:$28 sps:$4 sm:$0xff]  }
   0xc   :  { %1077 = vmatprep.subr.bf16.mxu0 %v1233_v12  ;;  %v1248_v27 = vld [vmem:[%s1638_s1 + $0xb0] sm:$0xff]   ;;  %v1252_v31 = vld [vmem:[%s1639_s0] ss:$28 sps:$4 sm:$0xff]   ;;  %v1259_v36 = vld [vmem:[%s1639_s0 + $0xc] ss:$28 sps:$4 sm:$0xff]  }
   0xd   :  { %1116 = vmatpush3.bf16.msra.mxu1 %v1232_v11  ;;  %v1255_v33 = vld [vmem:[%s1638_s1 + $0xb8] sm:$0xff]   ;;  %v1260_v37 = vld [vmem:[%s1638_s1 + $0x100] sm:$0xff]   ;;  %736 = vmatprep.mubr.bf16.mxu1 %v1259_v36  ;;  %v1261_v38 = vld [vmem:[%s1638_s1 + $0x148] sm:$0xff]  }
   0xe   :  { %1117 = vmatprep.subr.bf16.mxu1 %v1235_v14  ;;  %v1262_v39 = vld [vmem:[%s1638_s1 + $0x108] sm:$0xff]   ;;  %v1263_v40 = vld [vmem:[%s1639_s0 + $0x3c] ss:$28 sps:$4 sm:$0xff]   ;;  %v1266_v42 = vld [vmem:[%s1638_s1 + $0x150] sm:$0xff]  }
   0xf   :  { %1078 = vmatpush3.bf16.msra.mxu0 %v1234_v13  ;;  %v1265_v41 = vld [vmem:[%s1639_s0 + $0x38] ss:$28 sps:$4 sm:$0xff]   ;;  %v1267_v43 = vld [vmem:[%s1639_s0 + $0x44] ss:$28 sps:$4 sm:$0xff]   ;;  %v1276_v50 = vld [vmem:[%s1639_s0 + $0x70] ss:$28 sps:$4 sm:$0xff]  }
  0x10   :  { %1079 = vmatprep.subr.bf16.mxu0 %v1237_v16  ;;  %v1269_v44 = vld [vmem:[%s1638_s1 + $0x110] sm:$0xff]   ;;  %v1270_v45 = vld [vmem:[%s1639_s0 + $0x40] ss:$28 sps:$4 sm:$0xff]   ;;  %v1278_v52 = vld [vmem:[%s1638_s1 + $0x188] sm:$0xff]  }
  0x11   :  { %1118 = vmatpush3.bf16.msra.mxu1 %v1236_v15  ;;  %v1271_v46 = vld [vmem:[%s1638_s1 + $0x158] sm:$0xff]   ;;  %v1272_v47 = vld [vmem:[%s1638_s1 + $0x180] sm:$0xff]   ;;  %v1274_v49 = vld [vmem:[%s1639_s0 + $0x74] ss:$28 sps:$4 sm:$0xff]  }
  0x12   :  { %1119 = vmatprep.subr.bf16.mxu1 %v1239_v18  ;;  %v1273_v48 = vld [vmem:[%s1638_s1 + $0x118] sm:$0xff]   ;;  %v1277_v51 = vld [vmem:[%s1638_s1 + $0x160] sm:$0xff]   ;;  %v1283_v56 = vld [vmem:[%s1638_s1 + $0x168] sm:$0xff]  }
  0x13   :  { %1080 = vmatpush3.bf16.msra.mxu0 %v1238_v17  ;;  %v1279_v53 = vld [vmem:[%s1639_s0 + $0x7c] ss:$28 sps:$4 sm:$0xff]   ;;  %v1281_v54 = vld [vmem:[%s1638_s1 + $0x120] sm:$0xff]   ;;  %v1284_v57 = vld [vmem:[%s1638_s1 + $0x190] sm:$0xff]  }
  0x14   :  { %1081 = vmatprep.subr.bf16.mxu0 %v1241_v20  ;;  %v1282_v55 = vld [vmem:[%s1639_s0 + $0x78] ss:$28 sps:$4 sm:$0xff]   ;;  %v1285_v58 = vld [vmem:[%s1638_s1 + $0x128] sm:$0xff]   ;;  %v1296_v3 = vld [vmem:[%s1638_s1 + $0x1a0] sm:$0xff]  }
  0x15   :  { %1120 = vmatpush3.bf16.msra.mxu1 %v1240_v19  ;;  %v1286_v59 = vld [vmem:[%s1639_s0 + $0xac] ss:$28 sps:$4 sm:$0xff]   ;;  %v1289_v61 = vld [vmem:[%s1638_s1 + $0x170] sm:$0xff]   ;;  %v1290_v62 = vld [vmem:[%s1638_s1 + $0x198] sm:$0xff]  }
  0x16   :  { %1121 = vmatprep.subr.bf16.mxu1 %v1243_v22  ;;  %v1288_v60 = vld [vmem:[%s1639_s0 + $0xa8] ss:$28 sps:$4 sm:$0xff]   ;;  %v1291_v63 = vld [vmem:[%s1639_s0 + $0xb4] ss:$28 sps:$4 sm:$0xff]   ;;  %v1295_v2 = vld [vmem:[%s1638_s1 + $0x178] sm:$0xff]  }
  0x17   :  { %1082 = vmatpush3.bf16.msra.mxu0 %v1242_v21  ;;  %v1293_v0 = vld [vmem:[%s1638_s1 + $0x130] sm:$0xff]   ;;  %v1297_v4 = vld [vmem:[%s1638_s1 + $0x138] sm:$0xff]   ;;  %v1301_v7 = vld [vmem:[%s1638_s1 + $0x1a8] sm:$0xff]  }
  0x18   :  { %1083 = vmatprep.subr.bf16.mxu0 %v1245_v24  ;;  %v1294_v1 = vld [vmem:[%s1639_s0 + $0xb0] ss:$28 sps:$4 sm:$0xff]   ;;  %v1302_v8 = vld [vmem:[%s1639_s0 + $0x18] ss:$28 sps:$4 sm:$0xff]   ;;  %v1310_v11 = vld [vmem:[%s1639_s0 + $0x88] ss:$28 sps:$4 sm:$0xff]  }
  0x19   :  { %1122 = vmatpush3.bf16.msra.mxu1 %v1244_v23  ;;  %v1298_v5 = vld [vmem:[%s1639_s0 + $0x10] ss:$28 sps:$4 sm:$0xff]   ;;  %v1306_v12 = vld [vmem:[%s1639_s0 + $0x48] ss:$28 sps:$4 sm:$0xff]   ;;  %v1311_v14 = vld [vmem:[%s1639_s0 + $0xc0] ss:$28 sps:$4 sm:$0xff]  }
  0x1a   :  { %1123 = vmatprep.subr.bf16.mxu1 %v1247_v26  ;;  %v1300_v6 = vld [vmem:[%s1639_s0 + $0x14] ss:$28 sps:$4 sm:$0xff]   ;;  %v1304_v10 = vld [vmem:[%s1639_s0 + $0x4c] ss:$28 sps:$4 sm:$0xff]   ;;  %v1307_v13 = vld [vmem:[%s1639_s0 + $0x84] ss:$28 sps:$4 sm:$0xff]  }
  0x1b   :  { %1084 = vmatpush3.bf16.msra.mxu0 %v1246_v25  ;;  %v1303_v9 = vld [vmem:[%s1639_s0 + $0x50] ss:$28 sps:$4 sm:$0xff]   ;;  %v1309_v15 = vld [vmem:[%s1639_s0 + $0x80] ss:$28 sps:$4 sm:$0xff]   ;;  %v1314_v17 = vld [vmem:[%s1639_s0 + $0xb8] ss:$28 sps:$4 sm:$0xff]  }
  0x1c   :  { %1085 = vmatprep.subr.bf16.mxu0 %v1249_v28  ;;  %v1312_v16 = vld [vmem:[%s1639_s0 + $0xbc] ss:$28 sps:$4 sm:$0xff]   ;;  %v968_v19 = vld [vmem:[%s1640_s2] ss:$0 sm:$0xff] }
  0x1d   :  { %1124 = vmatpush3.bf16.msra.mxu1 %v1248_v27 }
  0x1e   :  { %1125 = vmatprep.subr.bf16.mxu1 %v1251_v30 }
  0x1f   :  { %1086 = vmatpush3.bf16.msra.mxu0 %v1250_v29 }
  0x20   :  { %1151 = vmatprep.subr.bf16.mxu0 %v1256_v34 }
  0x21   :  { %1126 = vmatpush3.bf16.msra.mxu1 %v1255_v33 }
  0x22   :  { %672 = vmatmul.mubr.bf16.vlgmr.msra.gmra.mrb[0].mxu0 %v1252_v31  ;;  %1201 = vmatprep.subr.bf16.mxu1 %v1272_v47 }
  0x23   :  { %1152 = vmatpush3.bf16.msra.mxu0 %v1260_v37  ;;  %679 = vmatprep.mubr.bf16.mxu0 %v1263_v40 }
  0x24   :  { %737 = vmatmul.mubr.bf16.vlgmr.msra.gmra.mrb[0].mxu1 %v1257_v35  ;;  %1153 = vmatprep.subr.bf16.mxu0 %v1261_v38 }
  0x25   :  { %744 = vmatprep.mubr.bf16.mxu1 %v1267_v43  ;;  %1202 = vmatpush3.bf16.msra.mxu1 %v1272_v47 }
  0x26   :  { %1203 = vmatprep.subr.bf16.mxu1 %v1278_v52 }
  0x27   :  { %1154 = vmatpush3.bf16.msra.mxu0 %v1262_v39 }
  0x28   :  { %1155 = vmatprep.subr.bf16.mxu0 %v1266_v42 }
  0x29   :  { %1204 = vmatpush3.bf16.msra.mxu1 %v1278_v52 }
  0x2a   :  { %680 = vmatmul.mubr.bf16.gmra.mrb[4].mxu0 %v1265_v41  ;;  %1205 = vmatprep.subr.bf16.mxu1 %v1284_v57 }
  0x2b   :  { %1156 = vmatpush3.bf16.msra.mxu0 %v1269_v44  ;;  %687 = vmatprep.mubr.bf16.mxu0 %v1274_v49 }
  0x2c   :  { %745 = vmatmul.mubr.bf16.gmra.mrb[4].mxu1 %v1270_v45  ;;  %1157 = vmatprep.subr.bf16.mxu0 %v1271_v46 }
  0x2d   :  { %752 = vmatprep.mubr.bf16.mxu1 %v1279_v53  ;;  %1206 = vmatpush3.bf16.msra.mxu1 %v1284_v57 }
  0x2e   :  { %1207 = vmatprep.subr.bf16.mxu1 %v1290_v62 }
  0x2f   :  { %1158 = vmatpush3.bf16.msra.mxu0 %v1273_v48 }
  0x30   :  { %1159 = vmatprep.subr.bf16.mxu0 %v1277_v51 }
  0x31   :  { %1208 = vmatpush3.bf16.msra.mxu1 %v1290_v62 }
  0x32   :  { %688 = vmatmul.mubr.bf16.gmra.mrb[8].mxu0 %v1276_v50  ;;  %1209 = vmatprep.subr.bf16.mxu1 %v1296_v3 }
  0x33   :  { %1160 = vmatpush3.bf16.msra.mxu0 %v1281_v54  ;;  %695 = vmatprep.mubr.bf16.mxu0 %v1286_v59 }
  0x34   :  { %753 = vmatmul.mubr.bf16.gmra.mrb[8].mxu1 %v1282_v55  ;;  %1161 = vmatprep.subr.bf16.mxu0 %v1283_v56 }
  0x35   :  { %760 = vmatprep.mubr.bf16.mxu1 %v1291_v63  ;;  %1210 = vmatpush3.bf16.msra.mxu1 %v1296_v3 }
  0x36   :  { %1211 = vmatprep.subr.bf16.mxu1 %v1301_v7 }
  0x37   :  { %1162 = vmatpush3.bf16.msra.mxu0 %v1285_v58 }
  0x38   :  { %1163 = vmatprep.subr.bf16.mxu0 %v1289_v61 }
  0x39   :  { %1212 = vmatpush3.bf16.msra.mxu1 %v1301_v7 }
  0x3a   :  { %696 = vmatmul.mubr.bf16.gmra.mrb[12].mxu0 %v1288_v60 }
  0x3b   :  { %1164 = vmatpush3.bf16.msra.mxu0 %v1293_v0  ;;  %801 = vmatprep.mubr.bf16.mxu0 %v1300_v6 }
  0x3c   :  { %761 = vmatmul.mubr.bf16.gmra.mrb[12].mxu1 %v1294_v1  ;;  %1165 = vmatprep.subr.bf16.mxu0 %v1295_v2 }
  0x3d   :  { %1213 = vmatprep.mubr.msk.bf16.mxu1 %vm626_vm0, %v1302_v8 }
  0x3f   :  { %1166 = vmatpush3.bf16.msra.mxu0 %v1297_v4 }
  0x42   :  { %802 = vmatmul.mubr.bf16.vlgmr.msra.gmra.mrb[16].mxu0 %v1298_v5 }
  0x43   :  { %809 = vmatprep.mubr.bf16.mxu0 %v1304_v10 }
  0x44   :  { %1214 = vmatmul.mubr.msk.bf16.vlgmr.msra.gmra.mrb[16].mxu1 %vm626_vm0, %v1303_v9 }
  0x45   :  { %1217 = vmatprep.mubr.msk.bf16.mxu1 %vm626_vm0, %v1310_v11 }
  0x4a   :  { %810 = vmatmul.mubr.bf16.gmra.mrb[20].mxu0 %v1306_v12 }
  0x4b   :  { %817 = vmatprep.mubr.bf16.mxu0 %v1307_v13 }
  0x4c   :  { %1218 = vmatmul.mubr.msk.bf16.gmra.mrb[20].mxu1 %vm626_vm0, %v1311_v14 }
  0x52   :  { %818 = vmatmul.mubr.bf16.gmra.mrb[24].mxu0 %v1309_v15 }
  0x53   :  { %825 = vmatprep.mubr.bf16.mxu0 %v1312_v16 }
  0x5a   :  { %826 = vmatmul.mubr.bf16.gmra.mrb[28].mxu0 %v1314_v17 }
  0xf5   :  { %v1087_v18 = vpop.f32.mrb[0].mxu0 }
  0xf6   :  { %v1088_v20 = vpop.f32.mrb[1].mxu0 }
  0xf7   :  { %v1089_v21 = vadd.f32 %v1088_v20, %v1087_v18  ;;  %v1090_v22 = vpop.f32.mrb[2].mxu0  ;;  %v1127_v23 = vpop.f32.mrb[0].mxu1 }
  0xf8   :  { %v1091_v24 = vpop.f32.mrb[3].mxu0  ;;  %v1128_v27 = vpop.f32.mrb[1].mxu1 }
  0xf9   :  { %v674_v25 = vadd.f32 %v1089_v21, %v968_v19  ;;  %v1092_v26 = vadd.f32 %v1091_v24, %v1090_v22  ;;  %v1129_v28 = vadd.f32 %v1128_v27, %v1127_v23  ;;  %v1130_v29 = vpop.f32.mrb[2].mxu1 }
  0xfa   :  { %v1131_v31 = vpop.f32.mrb[3].mxu1 }
  0xfb   :  { %v677_v30 = vadd.f32 %v1092_v26, %v968_v19  ;;  %v739_v32 = vadd.f32 %v1129_v28, %v674_v25  ;;  %v1132_v33 = vadd.f32 %v1131_v31, %v1130_v29 }
  0xfd   :  { %v1093_v34 = vpop.f32.mrb[4].mxu0  ;;  %v742_v35 = vadd.f32 %v1132_v33, %v677_v30 }
  0xfe   :  { %v1094_v36 = vpop.f32.mrb[5].mxu0 }
  0xff   :  { %v1095_v37 = vadd.f32 %v1094_v36, %v1093_v34  ;;  %v1096_v38 = vpop.f32.mrb[6].mxu0  ;;  %v1133_v39 = vpop.f32.mrb[4].mxu1 }
 0x100   :  { %v1097_v40 = vpop.f32.mrb[7].mxu0  ;;  %v1134_v43 = vpop.f32.mrb[5].mxu1 }
 0x101   :  { %v682_v41 = vadd.f32 %v1095_v37, %v968_v19  ;;  %v1098_v42 = vadd.f32 %v1097_v40, %v1096_v38  ;;  %v1135_v44 = vadd.f32 %v1134_v43, %v1133_v39  ;;  %v1136_v45 = vpop.f32.mrb[6].mxu1 }
 0x102   :  { %v1137_v47 = vpop.f32.mrb[7].mxu1 }
 0x103   :  { %v685_v46 = vadd.f32 %v1098_v42, %v968_v19  ;;  %v1588_v48 = vadd.f32 %v1135_v44, %v682_v41  ;;  %v1138_v49 = vadd.f32 %v1137_v47, %v1136_v45 }
 0x105   :  { %v1099_v50 = vpop.f32.mrb[8].mxu0  ;;  %v1590_v51 = vadd.f32 %v1138_v49, %v685_v46 }
 0x106   :  { %v1100_v52 = vpop.f32.mrb[9].mxu0 }
 0x107   :  { %v1101_v53 = vadd.f32 %v1100_v52, %v1099_v50  ;;  %v1102_v54 = vpop.f32.mrb[10].mxu0  ;;  %v1139_v55 = vpop.f32.mrb[8].mxu1 }
 0x108   :  { %v1103_v56 = vpop.f32.mrb[11].mxu0  ;;  %v1140_v59 = vpop.f32.mrb[9].mxu1 }
 0x109   :  { %v690_v57 = vadd.f32 %v1101_v53, %v968_v19  ;;  %v1104_v58 = vadd.f32 %v1103_v56, %v1102_v54  ;;  %v1141_v60 = vadd.f32 %v1140_v59, %v1139_v55  ;;  %v1142_v61 = vpop.f32.mrb[10].mxu1 }
 0x10a   :  { %v1143_v63 = vpop.f32.mrb[11].mxu1 }
 0x10b   :  { %v693_v62 = vadd.f32 %v1104_v58, %v968_v19  ;;  %v1592_v0 = vadd.f32 %v1141_v60, %v690_v57  ;;  %v1144_v1 = vadd.f32 %v1143_v63, %v1142_v61 }
 0x10d   :  { %v1105_v2 = vpop.f32.mrb[12].mxu0  ;;  %v1594_v3 = vadd.f32 %v1144_v1, %v693_v62 }
 0x10e   :  { %v1106_v4 = vpop.f32.mrb[13].mxu0 }
 0x10f   :  { %v1107_v5 = vadd.f32 %v1106_v4, %v1105_v2  ;;  %v1108_v6 = vpop.f32.mrb[14].mxu0  ;;  %v1145_v7 = vpop.f32.mrb[12].mxu1 }
 0x110   :  { %v1109_v8 = vpop.f32.mrb[15].mxu0  ;;  %v1146_v11 = vpop.f32.mrb[13].mxu1 }
 0x111   :  { %v698_v9 = vadd.f32 %v1107_v5, %v968_v19  ;;  %v1110_v10 = vadd.f32 %v1109_v8, %v1108_v6  ;;  %v1147_v12 = vadd.f32 %v1146_v11, %v1145_v7  ;;  %v1148_v13 = vpop.f32.mrb[14].mxu1 }
 0x112   :  { %v1149_v15 = vpop.f32.mrb[15].mxu1 }
 0x113   :  { %v701_v14 = vadd.f32 %v1110_v10, %v968_v19  ;;  %v1596_v16 = vadd.f32 %v1147_v12, %v698_v9  ;;  %v1150_v17 = vadd.f32 %v1149_v15, %v1148_v13 }
 0x115   :  { %v1598_v18 = vadd.f32 %v1150_v17, %v701_v14  ;;  %v1167_v20 = vpop.f32.mrb[16].mxu0 }
 0x116   :  { %v1168_v21 = vpop.f32.mrb[17].mxu0 }
 0x117   :  { %v1169_v22 = vadd.f32 %v1168_v21, %v1167_v20  ;;  %v1170_v23 = vpop.f32.mrb[18].mxu0  ;;  %v1215_v25 = vpop.f32.mrb[16].mxu1 }
 0x118   :  { %v1171_v24 = vpop.f32.mrb[19].mxu0  ;;  %v868_v28 = vpop.f32.mrb[17].mxu1 }
 0x119   :  { %v1172_v26 = vadd.f32 %v1171_v24, %v1170_v23  ;;  %v804_v27 = vadd.f32 %v1169_v22, %v739_v32  ;;  %v1216_v29 = vpop.f32.mrb[18].mxu1 }
 0x11a   :  { %v871_v33 = vpop.f32.mrb[19].mxu1 }
 0x11b   :  { %v869_v30 = vadd.f32 %v868_v28, %v804_v27  ;;  %v807_v31 = vadd.f32 %v1172_v26, %v742_v35 }
 0x11d   :  { %vm899_vm1 = vcmp.gt.f32.partialorder %v869_v30, 0.0  ;;  %v907_v19 = vmul.f32 0.1, %v869_v30  ;;  %v872_v34 = vadd.f32 %v871_v33, %v807_v31  ;;  %v1173_v36 = vpop.f32.mrb[20].mxu0 }
 0x11e   :  { %v1174_v37 = vpop.f32.mrb[21].mxu0 }
 0x11f   :  { %v915_v38 = vsel %vm899_vm1, %v869_v30, %v907_v19  ;;  %vm900_vm3 = vcmp.gt.f32.partialorder %v872_v34, 0.0  ;;  %v908_v39 = vmul.f32 0.1, %v872_v34  ;;  %v1175_v40 = vadd.f32 %v1174_v37, %v1173_v36  ;;  %v1176_v41 = vpop.f32.mrb[22].mxu0  ;;  %v1219_v44 = vpop.f32.mrb[20].mxu1 }
 0x120   :  { %v1063_v42 = vpack.c.bf16 %v915_v38, %v915_v38  ;;  %v1177_v43 = vpop.f32.mrb[23].mxu0  ;;  %v884_v35 = vpop.f32.mrb[21].mxu1 }
 0x121   :  { %v916_v32 = vsel %vm900_vm3, %v872_v34, %v908_v39  ;;  %v812_v45 = vadd.f32 %v1175_v40, %v1588_v48  ;;  %v1178_v46 = vadd.f32 %v1177_v43, %v1176_v41  ;;  %v1220_v49 = vpop.f32.mrb[22].mxu1 }
 0x122   :  { %956 = vst.msk [vmem:[%s1641_s3] sm:$0xf] %vm955_vm2, %v1063_v42  ;;  %v1064_v47 = vpack.c.bf16 %v916_v32, %v916_v32  ;;  %v887_v53 = vpop.f32.mrb[23].mxu1 }
 0x123   :  { %v877_v50 = vadd.f32 %v1215_v25, %v812_v45  ;;  %v815_v52 = vadd.f32 %v1178_v46, %v1590_v51 }
 0x124   :  { %957 = vst.msk [vmem:[%s1641_s3 + $0x4] sm:$0xf] %vm955_vm2, %v1064_v47 }
 0x125   :  { %vm901_vm4 = vcmp.gt.f32.partialorder %v877_v50, 0.0  ;;  %v909_v48 = vmul.f32 0.1, %v877_v50  ;;  %v880_v54 = vadd.f32 %v1216_v29, %v815_v52  ;;  %v1179_v55 = vpop.f32.mrb[24].mxu0 }
 0x126   :  { %v1180_v56 = vpop.f32.mrb[25].mxu0 }
 0x127   :  { %v917_v57 = vsel %vm901_vm4, %v877_v50, %v909_v48  ;;  %vm902_vm5 = vcmp.gt.f32.partialorder %v880_v54, 0.0  ;;  %v910_v58 = vmul.f32 0.1, %v880_v54  ;;  %v1181_v59 = vadd.f32 %v1180_v56, %v1179_v55  ;;  %v1182_v60 = vpop.f32.mrb[26].mxu0 }
 0x128   :  { %v1065_v61 = vpack.c.bf16 %v917_v57, %v917_v57  ;;  %v1183_v62 = vpop.f32.mrb[27].mxu0 }
 0x129   :  { %v918_v63 = vsel %vm902_vm5, %v880_v54, %v910_v58  ;;  %v1184_v51 = vadd.f32 %v1183_v62, %v1182_v60  ;;  %v820_v1 = vadd.f32 %v1181_v59, %v1592_v0 }
 0x12a   :  { %958 = vst.msk [vmem:[%s1641_s3 + $0x8] sm:$0xf] %vm955_vm2, %v1065_v61  ;;  %v1066_v2 = vpack.c.bf16 %v918_v63, %v918_v63 }
 0x12b   :  { %v885_v4 = vadd.f32 %v884_v35, %v820_v1  ;;  %v823_v5 = vadd.f32 %v1184_v51, %v1594_v3 }
 0x12c   :  { %959 = vst.msk [vmem:[%s1641_s3 + $0xc] sm:$0xf] %vm955_vm2, %v1066_v2 }
 0x12d   :  { %vm903_vm6 = vcmp.gt.f32.partialorder %v885_v4, 0.0  ;;  %v911_v6 = vmul.f32 0.1, %v885_v4  ;;  %v888_v7 = vadd.f32 %v887_v53, %v823_v5  ;;  %v1185_v8 = vpop.f32.mrb[28].mxu0 }
 0x12e   :  { %v1186_v9 = vpop.f32.mrb[29].mxu0 }
 0x12f   :  { %v919_v0 = vsel %vm903_vm6, %v885_v4, %v911_v6  ;;  %vm904_vm7 = vcmp.gt.f32.partialorder %v888_v7, 0.0  ;;  %v912_v10 = vmul.f32 0.1, %v888_v7  ;;  %v1187_v11 = vadd.f32 %v1186_v9, %v1185_v8  ;;  %v1188_v12 = vpop.f32.mrb[30].mxu0 }
 0x130   :  { %v1067_v13 = vpack.c.bf16 %v919_v0, %v919_v0  ;;  %v1189_v14 = vpop.f32.mrb[31].mxu0 }
 0x131   :  { %v920_v15 = vsel %vm904_vm7, %v888_v7, %v912_v10  ;;  %v828_v3 = vadd.f32 %v1187_v11, %v1596_v16  ;;  %v1190_v17 = vadd.f32 %v1189_v14, %v1188_v12 }
 0x132   :  { %960 = vst.msk [vmem:[%s1641_s3 + $0x10] sm:$0xf] %vm955_vm2, %v1067_v13  ;;  %v1068_v20 = vpack.c.bf16 %v920_v15, %v920_v15 }
 0x133   :  { %v893_v21 = vadd.f32 %v1219_v44, %v828_v3  ;;  %v831_v22 = vadd.f32 %v1190_v17, %v1598_v18 }
 0x134   :  { %961 = vst.msk [vmem:[%s1641_s3 + $0x14] sm:$0xf] %vm955_vm2, %v1068_v20 }
 0x135   :  { %vm905_vm8 = vcmp.gt.f32.partialorder %v893_v21, 0.0  ;;  %v913_v23 = vmul.f32 0.1, %v893_v21  ;;  %v896_v24 = vadd.f32 %v1220_v49, %v831_v22 }
 0x137   :  { %v921_v25 = vsel %vm905_vm8, %v893_v21, %v913_v23  ;;  %vm906_vm9 = vcmp.gt.f32.partialorder %v896_v24, 0.0  ;;  %v914_v16 = vmul.f32 0.1, %v896_v24 }
 0x138   :  { %v1069_v26 = vpack.c.bf16 %v921_v25, %v921_v25 }
 0x139   :  { %v922_v27 = vsel %vm906_vm9, %v896_v24, %v914_v16 }
 0x13a   :  { %962 = vst.msk [vmem:[%s1641_s3 + $0x18] sm:$0xf] %vm955_vm2, %v1069_v26  ;;  %v1070_v28 = vpack.c.bf16 %v922_v27, %v922_v27 }
 0x13c   :  { %963 = vst.msk [vmem:[%s1641_s3 + $0x1c] sm:$0xf] %vm955_vm2, %v1070_v28 }

// kernel: voxnet_encoder_forward.7
= control target key start
LH: loop header
LB: loop body
LE: loop exit
PB: predicated region body
PF: predicated region fallthrough
CT: control target
= control target key end

     0   :  { %v265_v2 = vmov 0   ;;  %s353_s0 = inlined_call_operand.vmem [shape: bf16[2,128], index: 0, kind: input, shape index: {}]   ;;  %s354_s1 = inlined_call_operand.vmem [shape: bf16[128,256], index: 1, kind: input, shape index: {}]   ;;  %s355_s2 = inlined_call_operand.vmem [shape: f32[1,256], index: 2, kind: input, shape index: {}]   ;;  %s356_s3 = inlined_call_operand.hbm [shape: f32[2,256], index: 3, kind: output, shape index: {}]  }
   0x1   :  { %v217_v0 = vld [vmem:[%s354_s1 + $0x4] ss:$8 sps:$4 sm:$0xff]   ;;  %v219_v1 = vld [vmem:[%s354_s1] ss:$8 sps:$4 sm:$0xff]   ;;  %157 = vmatprep.mubr.bf16.mxu0 %v265_v2  ;;  %v220_v3 = vld [vmem:[%s354_s1 + $0x14] ss:$8 sps:$4 sm:$0xff]  }
   0x2   :  { %125 = vmatprep.subr.bf16.mxu0 %v217_v0  ;;  %v222_v4 = vld [vmem:[%s354_s1 + $0x10] ss:$8 sps:$4 sm:$0xff]   ;;  %v223_v5 = vld [vmem:[%s354_s1 + $0x24] ss:$8 sps:$4 sm:$0xff]   ;;  %v225_v6 = vld [vmem:[%s354_s1 + $0x20] ss:$8 sps:$4 sm:$0xff]  }
   0x3   :  { %126 = vmatpush1.bf16.msra.mxu0 %v219_v1  ;;  %v226_v7 = vld [vmem:[%s354_s1 + $0x34] ss:$8 sps:$4 sm:$0xff]   ;;  %v228_v8 = vld [vmem:[%s354_s1 + $0x30] ss:$8 sps:$4 sm:$0xff]  }
   0x4   :  { %127 = vmatprep.subr.bf16.mxu0 %v220_v3 }
   0x7   :  { %128 = vmatpush1.bf16.msra.mxu0 %v222_v4 }
   0x8   :  { %129 = vmatprep.subr.bf16.mxu0 %v223_v5 }
   0xb   :  { %130 = vmatpush1.bf16.msra.mxu0 %v225_v6 }
   0xc   :  { %8 = vsyncpa [#allocation3], 0  ;;  %131 = vmatprep.subr.bf16.mxu0 %v226_v7  ;;  %v229_v9 = vld [vmem:[%s354_s1 + $0x44] ss:$8 sps:$4 sm:$0xff]   ;;  %v231_v10 = vld [vmem:[%s354_s1 + $0x40] ss:$8 sps:$4 sm:$0xff]   ;;  %v35_v18 = vlaneseq }
   0xd   :  { %v232_v11 = vld [vmem:[%s354_s1 + $0x54] ss:$8 sps:$4 sm:$0xff]   ;;  %v234_v12 = vld [vmem:[%s354_s1 + $0x50] ss:$8 sps:$4 sm:$0xff]   ;;  %v235_v13 = vld [vmem:[%s354_s1 + $0x64] ss:$8 sps:$4 sm:$0xff]  }
   0xe   :  { %v237_v14 = vld [vmem:[%s354_s1 + $0x60] ss:$8 sps:$4 sm:$0xff]   ;;  %v238_v15 = vld [vmem:[%s354_s1 + $0x74] ss:$8 sps:$4 sm:$0xff]   ;;  %v240_v16 = vld [vmem:[%s354_s1 + $0x70] ss:$8 sps:$4 sm:$0xff]  }
   0xf   :  { %132 = vmatpush1.bf16.msra.mxu0 %v228_v8  ;;  %v16_v17 = vld [vmem:[%s353_s0] sm:$0x1]  ;;  %v36_v19 = vshrl.u32 %v35_v18, 7  ;;  %s266_s0 = smov [#allocation2]  }
  0x10   :  { %133 = vmatprep.subr.bf16.mxu0 %v229_v9  ;;  %v33_v21 = vld [vmem:[%s355_s2] sm:$0x3]  ;;  %s190_s1 = sshll.u32 %s266_s0, 4  ;;  %s191_s1 = int_to_ptr.vmem [resolvable:$true] %s190_s1 }
  0x11   :  { %v37_v20 = vsub.s32 0, %v36_v19  ;;  %v41_v22 = vsub.s32 1, %v36_v19  ;;  %s241_s2 = scalar_lea.vmem %s191_s1, 64  ;;  %p246_p1 = scmp.lt.s32.totalorder %s191_s1, %s191_s1 }
  0x12   :  { %p242_p0 = scmp.ne.s32.totalorder %s191_s1, %s241_s2  ;;  %p247_p2 = scmp.lt.s32.totalorder %s241_s2, %s241_s2 }
  0x13   :  { %134 = vmatpush1.bf16.msra.mxu0 %v231_v10  ;;  %v38_v23 = vrot.slane %v33_v21, %v37_v20  ;;  %v42_v24 = vrot.slane %v33_v21, %v41_v22 }
  0x14   :  { %135 = vmatprep.subr.bf16.mxu0 %v232_v11  ;;  %p248_p3 = por %p247_p2, %p246_p1 }
  0x16   :  { %p249_p4 = pnand %p248_p3, %p242_p0 }
  0x17   :  { %136 = vmatpush1.bf16.msra.mxu0 %v234_v12 }
  0x18   :  { %137 = vmatprep.subr.bf16.mxu0 %v235_v13 }
  0x1b   :  { %138 = vmatpush1.bf16.msra.mxu0 %v237_v14 }
  0x1c   :  { %139 = vmatprep.subr.bf16.mxu0 %v238_v15 }
  0x1f   :  { %140 = vmatpush1.bf16.msra.mxu0 %v240_v16 }
  0x22   :  { %158 = vmatmul.mubr.bf16.vlgmr.msra.gmra.mrb[0].mxu0 %v16_v17 }
  0xf5   :  { %v159_v25 = vpop.f32.mrb[0].mxu0 }
  0xf6   :  { %v160_v26 = vadd.f32 %v159_v25, %v38_v23  ;;  %v161_v27 = vpop.f32.mrb[1].mxu0 }
  0xf7   :  { %v162_v28 = vadd.f32 %v161_v27, %v42_v24  ;;  %v163_v29 = vpop.f32.mrb[2].mxu0 }
  0xf8   :  { %vm166_vm0 = vcmp.gt.f32.partialorder %v160_v26, 0.0  ;;  %v168_v30 = vmul.f32 0.01, %v160_v26  ;;  %v164_v31 = vpop.f32.mrb[3].mxu0 }
  0xf9   :  { %vm167_vm1 = vcmp.gt.f32.partialorder %v162_v28, 0.0  ;;  %v169_v32 = vmul.f32 0.01, %v162_v28 }
  0xfa   :  { %v170_v33 = vsel %vm166_vm0, %v160_v26, %v168_v30 }
  0xfb   :  { %v171_v34 = vsel %vm167_vm1, %v162_v28, %v169_v32 }
  0xfc   :  { %v174_v35 = vcombine.low %v170_v33, %v171_v34 }
  0xfe   :  { %214 = vst.sshfl [vmem:[#allocation2] sm:$0x33 pattern:$0x76325410] %v174_v35 }
  0xff   :  { %252 = shalt.err (!%p249_p4)
}
 0x100   :  { %s253_s23 = scalar_lea.hbm %s356_s3, 64 }
 0x101   :  { %p254_p5 = scmp.ne.s32.totalorder %s356_s3, %s253_s23  ;;  %p257_p6 = scmp.lt.u32.totalorder %s253_s23, %s356_s3 }
 0x103   :  { %p259_p7 = pnand %p257_p6, %p254_p5 }
 0x105   :  { %262 = shalt.err (!%p259_p7)
}
 0x106   :  { %193 = dma.vmem_to_hbm [thread:$0]  %s191_s1, 64, %s356_s3, [#allocation3]  }
 0x107   :  { %263 = dma.done.wait [#allocation3], 64  }
 0x108   :  { %264 = vsyncadd [#allocation3], 4294967232 }
 0x109   :  { %197 = vsyncpa [#allocation3], 1 }

// kernel: voxnet_encoder_forward.6
= control target key start
LH: loop header
LB: loop body
LE: loop exit
PB: predicated region body
PF: predicated region fallthrough
CT: control target
= control target key end

     0   :  { %s136_s13 = smov 96   ;;  %vm104_vm0 = vcmask 253952   ;;  %vm105_vm1 = vsmask.f32 256  ;;  %s319_s0 = inlined_call_operand.vmem [shape: bf16[4,2,2,2,1,64], index: 0, kind: input, shape index: {}]   ;;  %s320_s1 = inlined_call_operand.vmem [shape: bf16[4,2,1,32], index: 1, kind: output, shape index: {}]  }
   0x1   :  { %v16_v0 = vld [vmem:[%s319_s0 + $0x8] sm:$0x1]  ;;  %v17_v1 = vld [vmem:[%s319_s0 + $0x9] sm:$0x1]  ;;  %v20_v2 = vld [vmem:[%s319_s0 + $0xc] sm:$0x1] }
   0x2   :  { %v21_v3 = vld [vmem:[%s319_s0 + $0xd] sm:$0x1]  ;;  %v42_v4 = vmax.bf16 %v17_v1, %v16_v0  ;;  %v8_v5 = vld [vmem:[%s319_s0] sm:$0x1]  ;;  %v9_v6 = vld [vmem:[%s319_s0 + $0x1] sm:$0x1] }
   0x3   :  { %v50_v7 = vmax.bf16 %v21_v3, %v20_v2  ;;  %v12_v8 = vld [vmem:[%s319_s0 + $0x4] sm:$0x1]  ;;  %v13_v9 = vld [vmem:[%s319_s0 + $0x5] sm:$0x1]  ;;  %v40_v10 = vmax.bf16 %v9_v6, %v8_v5  ;;  %v18_v11 = vld [vmem:[%s319_s0 + $0xa] sm:$0x1] }
   0x4   :  { %v48_v12 = vmax.bf16 %v13_v9, %v12_v8  ;;  %v19_v13 = vld [vmem:[%s319_s0 + $0xb] sm:$0x1]  ;;  %v22_v14 = vld [vmem:[%s319_s0 + $0xe] sm:$0x1]  ;;  %v23_v15 = vld [vmem:[%s319_s0 + $0xf] sm:$0x1] }
   0x5   :  { %v58_v16 = vmax.bf16 %v50_v7, %v42_v4  ;;  %v43_v17 = vmax.bf16 %v19_v13, %v18_v11  ;;  %v51_v18 = vmax.bf16 %v23_v15, %v22_v14  ;;  %v10_v19 = vld [vmem:[%s319_s0 + $0x2] sm:$0x1]  ;;  %v11_v20 = vld [vmem:[%s319_s0 + $0x3] sm:$0x1]  ;;  %v14_v21 = vld [vmem:[%s319_s0 + $0x6] sm:$0x1] }
   0x6   :  { %v56_v22 = vmax.bf16 %v48_v12, %v40_v10  ;;  %v15_v23 = vld [vmem:[%s319_s0 + $0x7] sm:$0x1]  ;;  %v41_v24 = vmax.bf16 %v11_v20, %v10_v19  ;;  %v26_v25 = vld [vmem:[%s319_s0 + $0x12] sm:$0x1]  ;;  %v27_v26 = vld [vmem:[%s319_s0 + $0x13] sm:$0x1] }
   0x7   :  { %76 = vrot.lane.b32.xlu1 %v58_v16, %s136_s13  ;;  %v59_v27 = vmax.bf16 %v51_v18, %v43_v17  ;;  %v49_v28 = vmax.bf16 %v15_v23, %v14_v21  ;;  %v30_v29 = vld [vmem:[%s319_s0 + $0x16] sm:$0x1]  ;;  %v31_v30 = vld [vmem:[%s319_s0 + $0x17] sm:$0x1]  ;;  %v45_v31 = vmax.bf16 %v27_v26, %v26_v25  ;;  %v24_v32 = vld [vmem:[%s319_s0 + $0x10] sm:$0x1] }
   0x8   :  { %72 = vrot.lane.b32.xlu0 %v56_v22, %s136_s13  ;;  %v53_v33 = vmax.bf16 %v31_v30, %v30_v29  ;;  %v25_v34 = vld [vmem:[%s319_s0 + $0x11] sm:$0x1]  ;;  %v28_v35 = vld [vmem:[%s319_s0 + $0x14] sm:$0x1]  ;;  %v29_v36 = vld [vmem:[%s319_s0 + $0x15] sm:$0x1] }
   0x9   :  { %v57_v37 = vmax.bf16 %v49_v28, %v41_v24  ;;  %v44_v38 = vmax.bf16 %v25_v34, %v24_v32  ;;  %v52_v39 = vmax.bf16 %v29_v36, %v28_v35  ;;  %v34_v40 = vld [vmem:[%s319_s0 + $0x1a] sm:$0x1]  ;;  %v35_v41 = vld [vmem:[%s319_s0 + $0x1b] sm:$0x1]  ;;  %v38_v42 = vld [vmem:[%s319_s0 + $0x1e] sm:$0x1] }
   0xa   :  { %v39_v43 = vld [vmem:[%s319_s0 + $0x1f] sm:$0x1]  ;;  %v32_v44 = vld [vmem:[%s319_s0 + $0x18] sm:$0x1]  ;;  %v33_v45 = vld [vmem:[%s319_s0 + $0x19] sm:$0x1]  ;;  %v61_v46 = vmax.bf16 %v53_v33, %v45_v31  ;;  %v47_v47 = vmax.bf16 %v35_v41, %v34_v40 }
   0xb   :  { %78 = vrot.lane.b32.xlu1 %v59_v27, %s136_s13  ;;  %v55_v48 = vmax.bf16 %v39_v43, %v38_v42  ;;  %v36_v49 = vld [vmem:[%s319_s0 + $0x1c] sm:$0x1]  ;;  %v37_v50 = vld [vmem:[%s319_s0 + $0x1d] sm:$0x1]  ;;  %v60_v51 = vmax.bf16 %v52_v39, %v44_v38  ;;  %v46_v52 = vmax.bf16 %v33_v45, %v32_v44  ;;  %vm251_vm2 = vmand %vm104_vm0, %vm105_vm1 }
   0xc   :  { %74 = vrot.lane.b32.xlu0 %v57_v37, %s136_s13  ;;  %v54_v53 = vmax.bf16 %v37_v50, %v36_v49  ;;  %v113_v57 = vld [vmem:[%s320_s1 + $0x2] sm:$0x1]  ;;  %v107_v60 = vld [vmem:[%s320_s1] sm:$0x1]  ;;  %v116_v1 = vld [vmem:[%s320_s1 + $0x3] sm:$0x1] }
   0xd   :  { %v63_v54 = vmax.bf16 %v55_v48, %v47_v47  ;;  %v110_v4 = vld [vmem:[%s320_s1 + $0x1] sm:$0x1]  ;;  %v122_v9 = vld [vmem:[%s320_s1 + $0x5] sm:$0x1]  ;;  %v119_v12 = vld [vmem:[%s320_s1 + $0x4] sm:$0x1] }
   0xe   :  { %v62_v55 = vmax.bf16 %v54_v53, %v46_v52  ;;  %v128_v17 = vld [vmem:[%s320_s1 + $0x7] sm:$0x1]  ;;  %v125_v20 = vld [vmem:[%s320_s1 + $0x6] sm:$0x1] }
   0xf   :  { %82 = vrot.lane.b32.xlu1 %v61_v46, %s136_s13 }
  0x10   :  { %80 = vrot.lane.b32.xlu0 %v60_v51, %s136_s13 }
  0x13   :  { %86 = vrot.lane.b32.xlu1 %v63_v54, %s136_s13 }
  0x14   :  { %84 = vrot.lane.b32.xlu0 %v62_v55, %s136_s13 }
  0x79   :  { %v77_v58 = vpop.permute.xlu1 %76 }
  0x7a   :  { %v98_v59 = vmax.bf16 %v77_v58, %v58_v16  ;;  %v73_v61 = vpop.permute.xlu0 %72 }
  0x7b   :  { %v96_v62 = vmax.bf16 %v73_v61, %v56_v22 }
  0x7c   :  { %v114_v63 = vsel %vm251_vm2, %v98_v59, %v113_v57 }
  0x7d   :  { %115 = vst [vmem:[%s320_s1 + $0x2] sm:$0x1] %v114_v63  ;;  %v108_v0 = vsel %vm251_vm2, %v96_v62, %v107_v60  ;;  %v79_v2 = vpop.permute.xlu1 %78 }
  0x7e   :  { %109 = vst [vmem:[%s320_s1] sm:$0x1] %v108_v0  ;;  %v99_v3 = vmax.bf16 %v79_v2, %v59_v27  ;;  %v75_v5 = vpop.permute.xlu0 %74 }
  0x7f   :  { %v97_v6 = vmax.bf16 %v75_v5, %v57_v37 }
  0x80   :  { %v117_v7 = vsel %vm251_vm2, %v99_v3, %v116_v1 }
  0x81   :  { %118 = vst [vmem:[%s320_s1 + $0x3] sm:$0x1] %v117_v7  ;;  %v111_v8 = vsel %vm251_vm2, %v97_v6, %v110_v4  ;;  %v83_v10 = vpop.permute.xlu1 %82 }
  0x82   :  { %112 = vst [vmem:[%s320_s1 + $0x1] sm:$0x1] %v111_v8  ;;  %v101_v11 = vmax.bf16 %v83_v10, %v61_v46  ;;  %v81_v13 = vpop.permute.xlu0 %80 }
  0x83   :  { %v100_v14 = vmax.bf16 %v81_v13, %v60_v51 }
  0x84   :  { %v123_v15 = vsel %vm251_vm2, %v101_v11, %v122_v9 }
  0x85   :  { %124 = vst [vmem:[%s320_s1 + $0x5] sm:$0x1] %v123_v15  ;;  %v120_v16 = vsel %vm251_vm2, %v100_v14, %v119_v12  ;;  %v87_v18 = vpop.permute.xlu1 %86 }
  0x86   :  { %121 = vst [vmem:[%s320_s1 + $0x4] sm:$0x1] %v120_v16  ;;  %v103_v19 = vmax.bf16 %v87_v18, %v63_v54  ;;  %v85_v21 = vpop.permute.xlu0 %84 }
  0x87   :  { %v102_v22 = vmax.bf16 %v85_v21, %v62_v55 }
  0x88   :  { %v129_v23 = vsel %vm251_vm2, %v103_v19, %v128_v17 }
  0x89   :  { %130 = vst [vmem:[%s320_s1 + $0x7] sm:$0x1] %v129_v23  ;;  %v126_v24 = vsel %vm251_vm2, %v102_v22, %v125_v20 }
  0x8a   :  { %127 = vst [vmem:[%s320_s1 + $0x6] sm:$0x1] %v126_v24 }

</bundles_post_ra>
